<compile_context>
chip_gen: v7x
topology: tpu7x:2x2x1
jax: 0.10.0
libtpu: 0.0.40
codegen_flags: <defaults>
</compile_context>

<pallas_src>
import functools
import math

import jax
import jax.numpy as jnp
from jax.experimental import pallas as pl
from jax.experimental.pallas import tpu as pltpu

# ----------------------- synthetic BERT config (small) -----------------------
VOCAB = 100
TYPE_VOCAB = 2
MAX_POS = 64
TEXT_DIM = 32          # BERT hidden size (TEXT_DIM in the reference code)
N_LAYERS = 2
N_HEADS = 2
HEAD_DIM = TEXT_DIM // N_HEADS
INTER = 64             # FFN intermediate size
D_L = 16               # Conv1d output channels (d_l)
EPS = 1e-12

# ----------------------- packed-operand slab layout ---------------------------
# Weight slab (bf16): one 2-D array, every sub-weight at a 16-row-aligned,
# lane-offset-0 position.  q/k/v segments of the fused QKV weight start at
# 128-lane boundaries so the in-kernel slices need no lane rotation.
QKV_PITCH = 128
W_COLS = 3 * QKV_PITCH                 # 384
OFF_WQKV = 0
OFF_WO = TEXT_DIM                      # 32
OFF_WI = 2 * TEXT_DIM                  # 64
OFF_WO2 = 3 * TEXT_DIM                 # 96
L_W_ROWS = 3 * TEXT_DIM + INTER        # 160 weight-slab rows per layer
CONV_ROW = N_LAYERS * L_W_ROWS         # conv taps live after the layer stack
W_ROWS = CONV_ROW + 2 * TEXT_DIM

# Vector-param slab (f32): one row per bias / LN gamma / LN beta.
V_COLS = W_COLS
V_EG, V_EB = 0, 1
V_L_BASE = 2
(VB_QKV, VB_BO, VB_LN1G, VB_LN1B, VB_BI, VB_BO2, VB_LN2G, VB_LN2B) = range(8)
V_L_ROWS = 8
V_ROWS = V_L_BASE + V_L_ROWS * N_LAYERS


# ------------------------------ math helpers ----------------------------------
def _layernorm(h, gamma, beta):
    mean = jnp.mean(h, axis=-1, keepdims=True)
    c = h - mean
    var = jnp.mean(c * c, axis=-1, keepdims=True)
    return c * jax.lax.rsqrt(var + EPS) * gamma + beta


def _gelu(x):
    # tanh-approx GELU (EUP tanh path).
    # TODO(synk): HF BertModel's default activation is erf-GELU; swap to an
    # exact erf if bit-level parity with PyTorch is required.
    return 0.5 * x * (1.0 + jnp.tanh(0.7978845608028654
                                     * (x + 0.044715 * x * x * x)))


# ------------------------------ fused model kernel ----------------------------
def _fused_bert_kernel(data_ref, w_ref, v_ref, out_ref, x_scr, *,
                       batch, seq, n_heads, head_dim, n_layers, inter, d_l):
    d = n_heads * head_dim
    rows = batch * seq
    scale = 1.0 / math.sqrt(head_dim)

    # ---- unpack the activation slab (both slices are (8,·)-row aligned) ----
    emb = data_ref[0:rows, 0:d]                       # [B*S, D] f32
    mask = data_ref[rows:2 * rows, 0:rows]            # [B*S, B*S] additive bias

    # ---- BERT embedding LayerNorm (no residual) ----
    x = _layernorm(emb, v_ref[V_EG:V_EG + 1, 0:d], v_ref[V_EB:V_EB + 1, 0:d])

    # ---- per-head lane masks: built ONCE, hoisted out of all loops ----
    lane = jax.lax.broadcasted_iota(jnp.int32, (rows, d), 1)
    head_masks = [jnp.logical_and(lane >= h * head_dim, lane < (h + 1) * head_dim)
                  for h in range(n_heads)]

    for l in range(n_layers):
        wb = l * L_W_ROWS
        vb = V_L_BASE + l * V_L_ROWS

        # ---- fused QKV projection: one bf16 [B*S, D] @ [D, 384] matmul ----
        qkv = jnp.dot(x.astype(jnp.bfloat16), w_ref[wb:wb + d, :],
                      preferred_element_type=jnp.float32)
        qkv = qkv + v_ref[vb + VB_QKV:vb + VB_QKV + 1, :]
        q = qkv[:, 0:d] * scale                        # lane-offset-0 slices
        k = qkv[:, QKV_PITCH:QKV_PITCH + d]
        v = qkv[:, 2 * QKV_PITCH:2 * QKV_PITCH + d]
        k16 = k.astype(jnp.bfloat16)

        # ---- multi-head self-attention on the packed [B*S, D] layout ----
        ctx = jnp.zeros((rows, d), jnp.float32)
        for h in range(n_heads):
            q_h = jnp.where(head_masks[h], q, 0.0).astype(jnp.bfloat16)
            # contraction over D only touches head-h lanes (rest are zero)
            s = jax.lax.dot_general(q_h, k16, (((1,), (1,)), ((), ())),
                                    preferred_element_type=jnp.float32)
            s = s + mask                               # block-diag + key mask
            s = s - jnp.max(s, axis=-1, keepdims=True)
            p = jnp.exp(s)
            p = p * pl.reciprocal(jnp.sum(p, axis=-1, keepdims=True),
                                  approx=True)
            v_h = jnp.where(head_masks[h], v, 0.0).astype(jnp.bfloat16)
            # each head writes a disjoint lane range -> plain accumulate
            ctx = ctx + jnp.dot(p.astype(jnp.bfloat16), v_h,
                                preferred_element_type=jnp.float32)

        # ---- attention output projection + residual LayerNorm ----
        attn = jnp.dot(ctx.astype(jnp.bfloat16),
                       w_ref[wb + OFF_WO:wb + OFF_WO + d, 0:d],
                       preferred_element_type=jnp.float32)
        attn = attn + v_ref[vb + VB_BO:vb + VB_BO + 1, 0:d]
        x = _layernorm(attn + x,
                       v_ref[vb + VB_LN1G:vb + VB_LN1G + 1, 0:d],
                       v_ref[vb + VB_LN1B:vb + VB_LN1B + 1, 0:d])

        # ---- feed-forward (GELU) + residual LayerNorm ----
        it = jnp.dot(x.astype(jnp.bfloat16),
                     w_ref[wb + OFF_WI:wb + OFF_WI + d, 0:inter],
                     preferred_element_type=jnp.float32)
        it = _gelu(it + v_ref[vb + VB_BI:vb + VB_BI + 1, 0:inter])
        ffn = jnp.dot(it.astype(jnp.bfloat16),
                      w_ref[wb + OFF_WO2:wb + OFF_WO2 + inter, 0:d],
                      preferred_element_type=jnp.float32)
        ffn = ffn + v_ref[vb + VB_BO2:vb + VB_BO2 + 1, 0:d]
        x = _layernorm(ffn + x,
                       v_ref[vb + VB_LN2G:vb + VB_LN2G + 1, 0:d],
                       v_ref[vb + VB_LN2B:vb + VB_LN2B + 1, 0:d])

    # ---- Conv1d(k=3, pad=1, no bias) evaluated ONLY at the last position ----
    # conv_out[:, :, -1] = W0^T h[S-2] + W1^T h[S-1]  (tap 2 hits the zero pad)
    x_scr[...] = x
    xa = x_scr[pl.ds(seq - 2, batch, stride=seq), :]   # [B, D] rows at t=S-2
    xb = x_scr[pl.ds(seq - 1, batch, stride=seq), :]   # [B, D] rows at t=S-1
    w0 = w_ref[CONV_ROW:CONV_ROW + d, 0:d_l]
    w1 = w_ref[CONV_ROW + d:CONV_ROW + 2 * d, 0:d_l]
    pooled = (jnp.dot(xa.astype(jnp.bfloat16), w0,
                      preferred_element_type=jnp.float32)
              + jnp.dot(xb.astype(jnp.bfloat16), w1,
                        preferred_element_type=jnp.float32))
    out_ref[...] = pooled.astype(out_ref.dtype)


# ------------------------------ parameter setup -------------------------------
def init_params(seed=0):
    key = jax.random.PRNGKey(seed)
    keys = iter(jax.random.split(key, 256))

    def nrm(shape):
        return (0.02 * jax.random.normal(next(keys), shape)).astype(jnp.float32)

    params = {
        "word_emb": nrm((VOCAB, TEXT_DIM)),
        "pos_emb": nrm((MAX_POS, TEXT_DIM)),
        "type_emb": nrm((TYPE_VOCAB, TEXT_DIM)),
        "emb_ln_g": 1.0 + nrm((TEXT_DIM,)),
        "emb_ln_b": nrm((TEXT_DIM,)),
        "layers": [],
        # proj_l = Conv1d(TEXT_DIM, D_L, k=3, pad=1, bias=False); tap k is the
        # torch weight[:, :, k].T with shape [TEXT_DIM, D_L].
        "conv_w0": nrm((TEXT_DIM, D_L)),
        "conv_w1": nrm((TEXT_DIM, D_L)),
        # Tap 2 only ever multiplies the zero pad at the last output position,
        # so it never reaches the kernel (the model returns conv[:, :, -1]).
        "conv_w2": nrm((TEXT_DIM, D_L)),
    }
    for _ in range(N_LAYERS):
        params["layers"].append({
            "wq": nrm((TEXT_DIM, TEXT_DIM)), "bq": nrm((TEXT_DIM,)),
            "wk": nrm((TEXT_DIM, TEXT_DIM)), "bk": nrm((TEXT_DIM,)),
            "wv": nrm((TEXT_DIM, TEXT_DIM)), "bv": nrm((TEXT_DIM,)),
            "wo": nrm((TEXT_DIM, TEXT_DIM)), "bo": nrm((TEXT_DIM,)),
            "ln1_g": 1.0 + nrm((TEXT_DIM,)), "ln1_b": nrm((TEXT_DIM,)),
            "wi": nrm((TEXT_DIM, INTER)), "bi": nrm((INTER,)),
            "wo2": nrm((INTER, TEXT_DIM)), "bo2": nrm((TEXT_DIM,)),
            "ln2_g": 1.0 + nrm((TEXT_DIM,)), "ln2_b": nrm((TEXT_DIM,)),
        })
    return params


def pack_params(params):
    """Pack ALL matmul weights into one bf16 slab and ALL bias/LN vectors into
    one f32 slab -> 3 operand DMAs at pallas_call time instead of 17."""
    w = jnp.zeros((W_ROWS, W_COLS), jnp.float32)
    v = jnp.zeros((V_ROWS, V_COLS), jnp.float32)
    v = v.at[V_EG, 0:TEXT_DIM].set(params["emb_ln_g"])
    v = v.at[V_EB, 0:TEXT_DIM].set(params["emb_ln_b"])
    for l, p in enumerate(params["layers"]):
        wb = l * L_W_ROWS
        vb = V_L_BASE + l * V_L_ROWS
        # fused QKV, each segment 128-lane aligned
        w = w.at[wb:wb + TEXT_DIM, 0:TEXT_DIM].set(p["wq"])
        w = w.at[wb:wb + TEXT_DIM, QKV_PITCH:QKV_PITCH + TEXT_DIM].set(p["wk"])
        w = w.at[wb:wb + TEXT_DIM,
                 2 * QKV_PITCH:2 * QKV_PITCH + TEXT_DIM].set(p["wv"])
        w = w.at[wb + OFF_WO:wb + OFF_WO + TEXT_DIM, 0:TEXT_DIM].set(p["wo"])
        w = w.at[wb + OFF_WI:wb + OFF_WI + TEXT_DIM, 0:INTER].set(p["wi"])
        w = w.at[wb + OFF_WO2:wb + OFF_WO2 + INTER, 0:TEXT_DIM].set(p["wo2"])
        v = v.at[vb + VB_QKV, 0:TEXT_DIM].set(p["bq"])
        v = v.at[vb + VB_QKV, QKV_PITCH:QKV_PITCH + TEXT_DIM].set(p["bk"])
        v = v.at[vb + VB_QKV, 2 * QKV_PITCH:2 * QKV_PITCH + TEXT_DIM].set(p["bv"])
        v = v.at[vb + VB_BO, 0:TEXT_DIM].set(p["bo"])
        v = v.at[vb + VB_LN1G, 0:TEXT_DIM].set(p["ln1_g"])
        v = v.at[vb + VB_LN1B, 0:TEXT_DIM].set(p["ln1_b"])
        v = v.at[vb + VB_BI, 0:INTER].set(p["bi"])
        v = v.at[vb + VB_BO2, 0:TEXT_DIM].set(p["bo2"])
        v = v.at[vb + VB_LN2G, 0:TEXT_DIM].set(p["ln2_g"])
        v = v.at[vb + VB_LN2B, 0:TEXT_DIM].set(p["ln2_b"])
    w = w.at[CONV_ROW:CONV_ROW + TEXT_DIM, 0:D_L].set(params["conv_w0"])
    w = w.at[CONV_ROW + TEXT_DIM:CONV_ROW + 2 * TEXT_DIM,
             0:D_L].set(params["conv_w1"])
    return {
        "word_emb": params["word_emb"],
        "pos_emb": params["pos_emb"],
        "type_emb": params["type_emb"],
        "wslab": w.astype(jnp.bfloat16),
        "vslab": v,
    }


# --------------------------------- forward ------------------------------------
@jax.jit
def euar_bert_forward(packed, input_ids, attention_mask=None, token_type_ids=None):
    B, S = input_ids.shape
    assert 2 <= S <= MAX_POS, "sequence length must be in [2, MAX_POS]"
    if attention_mask is None:
        attention_mask = jnp.ones((B, S), jnp.float32)
    if token_type_ids is None:
        token_type_ids = jnp.zeros((B, S), jnp.int32)

    # BERT embedding gathers are XLA glue; everything downstream is one kernel.
    emb = (packed["word_emb"][input_ids]
           + packed["pos_emb"][:S][None, :, :]
           + packed["type_emb"][token_type_ids])
    emb = emb.reshape(B * S, TEXT_DIM).astype(jnp.float32)

    # Additive attention bias on the packed [B*S, B*S] score matrix:
    #   * cross-batch pairs get -1e4 (exp underflows to exactly 0 in f32),
    #   * in-batch keys get the usual (1 - mask) * -1e4 extended mask.
    rows = B * S
    key_bias = ((1.0 - attention_mask.astype(jnp.float32)) * -10000.0).reshape(rows)
    batch_of = jnp.arange(rows, dtype=jnp.int32) // S
    same = batch_of[:, None] == batch_of[None, :]
    mask_full = jnp.where(same, key_bias[None, :], -10000.0)        # [B*S, B*S]

    # Pack activations + mask into one operand (one DMA).
    width = max(TEXT_DIM, rows)
    data = jnp.zeros((2 * rows, width), jnp.float32)
    data = data.at[0:rows, 0:TEXT_DIM].set(emb)
    data = data.at[rows:2 * rows, 0:rows].set(mask_full)

    kernel = functools.partial(_fused_bert_kernel, batch=B, seq=S,
                               n_heads=N_HEADS, head_dim=HEAD_DIM,
                               n_layers=N_LAYERS, inter=INTER, d_l=D_L)

    pooled = pl.pallas_call(
        kernel,
        out_shape=jax.ShapeDtypeStruct((B, D_L), jnp.float32),
        # Whole model fits easily in VMEM at these sizes: grid=(), 3 operands,
        # every operand is a full-array VMEM block (one DMA each).
        in_specs=[pl.BlockSpec(memory_space=pltpu.MemorySpace.VMEM)] * 3,
        out_specs=pl.BlockSpec(memory_space=pltpu.MemorySpace.VMEM),
        scratch_shapes=[pltpu.VMEM((rows, TEXT_DIM), jnp.float32)],
    )(data, packed["wslab"], packed["vslab"])
    return pooled                                       # [B, d_l]


# -------------------------- pure-JAX reference (no Pallas) --------------------
def reference_forward(params, input_ids, attention_mask=None, token_type_ids=None):
    """Same math (incl. bf16 matmul casts) as the kernel, standard layouts."""
    B, S = input_ids.shape
    if attention_mask is None:
        attention_mask = jnp.ones((B, S), jnp.float32)
    if token_type_ids is None:
        token_type_ids = jnp.zeros((B, S), jnp.int32)
    bf, f32 = jnp.bfloat16, jnp.float32

    def proj(a, w, b):
        return jnp.einsum("bsd,de->bse", a.astype(bf), w.astype(bf),
                          preferred_element_type=f32) + b

    emb = (params["word_emb"][input_ids]
           + params["pos_emb"][:S][None, :, :]
           + params["type_emb"][token_type_ids])
    x = _layernorm(emb, params["emb_ln_g"], params["emb_ln_b"])
    bias = ((1.0 - attention_mask.astype(f32)) * -10000.0)[:, None, None, :]
    scale = 1.0 / math.sqrt(HEAD_DIM)
    for p in params["layers"]:
        q = proj(x, p["wq"], p["bq"]).reshape(B, S, N_HEADS, HEAD_DIM)
        k = proj(x, p["wk"], p["bk"]).reshape(B, S, N_HEADS, HEAD_DIM)
        v = proj(x, p["wv"], p["bv"]).reshape(B, S, N_HEADS, HEAD_DIM)
        s = jnp.einsum("bqhd,bkhd->bhqk", (q * scale).astype(bf), k.astype(bf),
                       preferred_element_type=f32) + bias
        a = jax.nn.softmax(s, axis=-1)
        ctx = jnp.einsum("bhqk,bkhd->bqhd", a.astype(bf), v.astype(bf),
                         preferred_element_type=f32).reshape(B, S, TEXT_DIM)
        x = _layernorm(proj(ctx, p["wo"], p["bo"]) + x, p["ln1_g"], p["ln1_b"])
        it = _gelu(proj(x, p["wi"], p["bi"]))
        x = _layernorm(proj(it, p["wo2"], p["bo2"]) + x, p["ln2_g"], p["ln2_b"])
    pooled = (jnp.dot(x[:, S - 2, :].astype(bf), params["conv_w0"].astype(bf),
                      preferred_element_type=f32)
              + jnp.dot(x[:, S - 1, :].astype(bf), params["conv_w1"].astype(bf),
                        preferred_element_type=f32))
    return pooled


# ----------------------------------- main --------------------------------------
if __name__ == "__main__":
    params = init_params(seed=0)
    packed = pack_params(params)

    B, S = 2, 8
    key = jax.random.PRNGKey(0)
    input_ids = jax.random.randint(key, (B, S), 0, VOCAB, dtype=jnp.int32)
    attention_mask = jnp.ones((B, S), jnp.float32)

    pooled = euar_bert_forward(packed, input_ids, attention_mask)
    pooled = jax.block_until_ready(pooled)

    assert pooled.shape == (B, D_L), pooled.shape
    assert pooled.dtype == jnp.float32
    assert bool(jnp.all(jnp.isfinite(pooled)))

    # Pure-JAX reference check (same bf16 matmul casts; tolerance covers the
    # approx-reciprocal softmax and MXU vs XLA accumulation-order differences
    # while still catching any structural/packing/gather bug).
    ref = jax.block_until_ready(reference_forward(params, input_ids, attention_mask))
    err = float(jnp.max(jnp.abs(pooled - ref)))
    assert err < 3e-2, f"kernel vs reference mismatch: max abs err {err}"

    print("KERNEL_OK")
</pallas_src>

<mosaic_0001>
module attributes {stable_mosaic.version = 11 : i64} {
  func.func @_fused_bert_kernel(%arg0: memref<32x32xf32, #tpu.memory_space<vmem>>, %arg1: memref<384x384xbf16, #tpu.memory_space<vmem>>, %arg2: memref<18x384xf32, #tpu.memory_space<vmem>>, %arg3: memref<2x16xf32, #tpu.memory_space<vmem>>, %arg4: memref<16x32xf32, #tpu.memory_space<vmem>>) attributes {dimension_semantics = [], scalar_prefetch = 0 : i64, scratch_operands = 1 : i64, tpu.core_type = #tpu.core_type<tc>} {
    %c0 = arith.constant 0 : index
    %c0_0 = arith.constant 0 : index
    %0 = vector.load %arg0[%c0, %c0_0] : memref<32x32xf32, #tpu.memory_space<vmem>>, vector<16x32xf32>
    %c16 = arith.constant 16 : index
    %c0_1 = arith.constant 0 : index
    %1 = vector.load %arg0[%c16, %c0_1] : memref<32x32xf32, #tpu.memory_space<vmem>>, vector<16x16xf32>
    %c0_2 = arith.constant 0 : index
    %c0_3 = arith.constant 0 : index
    %2 = vector.load %arg2[%c0_2, %c0_3] : memref<18x384xf32, #tpu.memory_space<vmem>>, vector<1x32xf32>
    %c1 = arith.constant 1 : index
    %c0_4 = arith.constant 0 : index
    %3 = vector.load %arg2[%c1, %c0_4] : memref<18x384xf32, #tpu.memory_space<vmem>>, vector<1x32xf32>
    %cst = arith.constant dense<0.000000e+00> : vector<16xf32>
    %4 = vector.multi_reduction <add>, %0, %cst [1] : vector<16x32xf32> to vector<16xf32>
    %5 = vector.shape_cast %4 : vector<16xf32> to vector<16x1xf32>
    %cst_5 = arith.constant 3.200000e+01 : f32
    %6 = vector.broadcast %cst_5 : f32 to vector<16x1xf32>
    %7 = arith.divf %5, %6 : vector<16x1xf32>
    %8 = vector.broadcast %7 : vector<16x1xf32> to vector<16x32xf32>
    %9 = arith.subf %0, %8 : vector<16x32xf32>
    %10 = arith.mulf %9, %9 : vector<16x32xf32>
    %cst_6 = arith.constant dense<0.000000e+00> : vector<16xf32>
    %11 = vector.multi_reduction <add>, %10, %cst_6 [1] : vector<16x32xf32> to vector<16xf32>
    %12 = vector.shape_cast %11 : vector<16xf32> to vector<16x1xf32>
    %cst_7 = arith.constant 3.200000e+01 : f32
    %13 = vector.broadcast %cst_7 : f32 to vector<16x1xf32>
    %14 = arith.divf %12, %13 : vector<16x1xf32>
    %cst_8 = arith.constant 9.99999996E-13 : f32
    %15 = vector.broadcast %cst_8 : f32 to vector<16x1xf32>
    %16 = arith.addf %14, %15 : vector<16x1xf32>
    %17 = math.rsqrt %16 : vector<16x1xf32>
    %18 = vector.broadcast %17 : vector<16x1xf32> to vector<16x32xf32>
    %19 = arith.mulf %9, %18 : vector<16x32xf32>
    %20 = vector.broadcast %2 : vector<1x32xf32> to vector<16x32xf32>
    %21 = arith.mulf %19, %20 : vector<16x32xf32>
    %22 = vector.broadcast %3 : vector<1x32xf32> to vector<16x32xf32>
    %23 = arith.addf %21, %22 : vector<16x32xf32>
    %24 = tpu.iota {dimensions = array<i32: 1>} : vector<16x32xi32>
    %c0_i32 = arith.constant 0 : i32
    %25 = vector.broadcast %c0_i32 : i32 to vector<16x32xi32>
    %26 = arith.cmpi sge, %24, %25 : vector<16x32xi32>
    %c16_i32 = arith.constant 16 : i32
    %27 = vector.broadcast %c16_i32 : i32 to vector<16x32xi32>
    %28 = arith.cmpi slt, %24, %27 : vector<16x32xi32>
    %29 = arith.andi %26, %28 : vector<16x32xi1>
    %c16_i32_9 = arith.constant 16 : i32
    %30 = vector.broadcast %c16_i32_9 : i32 to vector<16x32xi32>
    %31 = arith.cmpi sge, %24, %30 : vector<16x32xi32>
    %c32_i32 = arith.constant 32 : i32
    %32 = vector.broadcast %c32_i32 : i32 to vector<16x32xi32>
    %33 = arith.cmpi slt, %24, %32 : vector<16x32xi32>
    %34 = arith.andi %31, %33 : vector<16x32xi1>
    %35 = arith.truncf %23 : vector<16x32xf32> to vector<16x32xbf16>
    %c0_10 = arith.constant 0 : index
    %c0_11 = arith.constant 0 : index
    %36 = vector.load %arg1[%c0_10, %c0_11] : memref<384x384xbf16, #tpu.memory_space<vmem>>, vector<32x384xbf16>
    %cst_12 = arith.constant dense<0.000000e+00> : vector<16x384xf32>
    %37 = tpu.matmul %35, %36, %cst_12 {dimension_numbers = #tpu.dot_dimension_numbers<[1], [0], [0], [1], [0, 0, 1, 1], [], []>} : vector<16x32xbf16>, vector<32x384xbf16>, vector<16x384xf32> -> vector<16x384xf32>
    %c2 = arith.constant 2 : index
    %c0_13 = arith.constant 0 : index
    %38 = vector.load %arg2[%c2, %c0_13] : memref<18x384xf32, #tpu.memory_space<vmem>>, vector<1x384xf32>
    %39 = vector.broadcast %38 : vector<1x384xf32> to vector<16x384xf32>
    %40 = arith.addf %37, %39 : vector<16x384xf32>
    %41 = vector.extract_strided_slice %40 {offsets = [0, 0], sizes = [16, 32], strides = [1, 1]} : vector<16x384xf32> to vector<16x32xf32>
    %cst_14 = arith.constant 2.500000e-01 : f32
    %42 = vector.broadcast %cst_14 : f32 to vector<16x32xf32>
    %43 = arith.mulf %41, %42 : vector<16x32xf32>
    %44 = vector.extract_strided_slice %40 {offsets = [0, 128], sizes = [16, 32], strides = [1, 1]} : vector<16x384xf32> to vector<16x32xf32>
    %45 = vector.extract_strided_slice %40 {offsets = [0, 256], sizes = [16, 32], strides = [1, 1]} : vector<16x384xf32> to vector<16x32xf32>
    %46 = arith.truncf %44 : vector<16x32xf32> to vector<16x32xbf16>
    %cst_15 = arith.constant 0.000000e+00 : f32
    %47 = vector.broadcast %cst_15 : f32 to vector<16x32xf32>
    %cst_16 = arith.constant 0.000000e+00 : f32
    %48 = vector.broadcast %cst_16 : f32 to vector<16x32xf32>
    %49 = arith.select %29, %43, %48 : vector<16x32xi1>, vector<16x32xf32>
    %50 = arith.truncf %49 : vector<16x32xf32> to vector<16x32xbf16>
    %cst_17 = arith.constant dense<0.000000e+00> : vector<16x16xf32>
    %51 = tpu.matmul %50, %46, %cst_17 {dimension_numbers = #tpu.dot_dimension_numbers<[1], [1], [0], [0], [0, 0, 1, 0], [], []>} : vector<16x32xbf16>, vector<16x32xbf16>, vector<16x16xf32> -> vector<16x16xf32>
    %52 = arith.addf %51, %1 : vector<16x16xf32>
    %cst_18 = arith.constant dense<0xFF800000> : vector<16xf32>
    %53 = vector.multi_reduction <maximumf>, %52, %cst_18 [1] : vector<16x16xf32> to vector<16xf32>
    %54 = vector.shape_cast %53 : vector<16xf32> to vector<16x1xf32>
    %55 = vector.broadcast %54 : vector<16x1xf32> to vector<16x16xf32>
    %56 = arith.subf %52, %55 : vector<16x16xf32>
    %57 = math.exp %56 : vector<16x16xf32>
    %cst_19 = arith.constant dense<0.000000e+00> : vector<16xf32>
    %58 = vector.multi_reduction <add>, %57, %cst_19 [1] : vector<16x16xf32> to vector<16xf32>
    %59 = vector.shape_cast %58 : vector<16xf32> to vector<16x1xf32>
    %60 = tpu.reciprocal %59 {approx = true} : vector<16x1xf32> -> vector<16x1xf32>
    %61 = vector.broadcast %60 : vector<16x1xf32> to vector<16x16xf32>
    %62 = arith.mulf %57, %61 : vector<16x16xf32>
    %cst_20 = arith.constant 0.000000e+00 : f32
    %63 = vector.broadcast %cst_20 : f32 to vector<16x32xf32>
    %64 = arith.select %29, %45, %63 : vector<16x32xi1>, vector<16x32xf32>
    %65 = arith.truncf %64 : vector<16x32xf32> to vector<16x32xbf16>
    %66 = arith.truncf %62 : vector<16x16xf32> to vector<16x16xbf16>
    %cst_21 = arith.constant dense<0.000000e+00> : vector<16x32xf32>
    %67 = tpu.matmul %66, %65, %cst_21 {dimension_numbers = #tpu.dot_dimension_numbers<[1], [0], [0], [1], [0, 0, 1, 1], [], []>} : vector<16x16xbf16>, vector<16x32xbf16>, vector<16x32xf32> -> vector<16x32xf32>
    %68 = arith.addf %47, %67 : vector<16x32xf32>
    %cst_22 = arith.constant 0.000000e+00 : f32
    %69 = vector.broadcast %cst_22 : f32 to vector<16x32xf32>
    %70 = arith.select %34, %43, %69 : vector<16x32xi1>, vector<16x32xf32>
    %71 = arith.truncf %70 : vector<16x32xf32> to vector<16x32xbf16>
    %cst_23 = arith.constant dense<0.000000e+00> : vector<16x16xf32>
    %72 = tpu.matmul %71, %46, %cst_23 {dimension_numbers = #tpu.dot_dimension_numbers<[1], [1], [0], [0], [0, 0, 1, 0], [], []>} : vector<16x32xbf16>, vector<16x32xbf16>, vector<16x16xf32> -> vector<16x16xf32>
    %73 = arith.addf %72, %1 : vector<16x16xf32>
    %cst_24 = arith.constant dense<0xFF800000> : vector<16xf32>
    %74 = vector.multi_reduction <maximumf>, %73, %cst_24 [1] : vector<16x16xf32> to vector<16xf32>
    %75 = vector.shape_cast %74 : vector<16xf32> to vector<16x1xf32>
    %76 = vector.broadcast %75 : vector<16x1xf32> to vector<16x16xf32>
    %77 = arith.subf %73, %76 : vector<16x16xf32>
    %78 = math.exp %77 : vector<16x16xf32>
    %cst_25 = arith.constant dense<0.000000e+00> : vector<16xf32>
    %79 = vector.multi_reduction <add>, %78, %cst_25 [1] : vector<16x16xf32> to vector<16xf32>
    %80 = vector.shape_cast %79 : vector<16xf32> to vector<16x1xf32>
    %81 = tpu.reciprocal %80 {approx = true} : vector<16x1xf32> -> vector<16x1xf32>
    %82 = vector.broadcast %81 : vector<16x1xf32> to vector<16x16xf32>
    %83 = arith.mulf %78, %82 : vector<16x16xf32>
    %cst_26 = arith.constant 0.000000e+00 : f32
    %84 = vector.broadcast %cst_26 : f32 to vector<16x32xf32>
    %85 = arith.select %34, %45, %84 : vector<16x32xi1>, vector<16x32xf32>
    %86 = arith.truncf %85 : vector<16x32xf32> to vector<16x32xbf16>
    %87 = arith.truncf %83 : vector<16x16xf32> to vector<16x16xbf16>
    %cst_27 = arith.constant dense<0.000000e+00> : vector<16x32xf32>
    %88 = tpu.matmul %87, %86, %cst_27 {dimension_numbers = #tpu.dot_dimension_numbers<[1], [0], [0], [1], [0, 0, 1, 1], [], []>} : vector<16x16xbf16>, vector<16x32xbf16>, vector<16x32xf32> -> vector<16x32xf32>
    %89 = arith.addf %68, %88 : vector<16x32xf32>
    %90 = arith.truncf %89 : vector<16x32xf32> to vector<16x32xbf16>
    %c32 = arith.constant 32 : index
    %c0_28 = arith.constant 0 : index
    %91 = vector.load %arg1[%c32, %c0_28] : memref<384x384xbf16, #tpu.memory_space<vmem>>, vector<32x32xbf16>
    %cst_29 = arith.constant dense<0.000000e+00> : vector<16x32xf32>
    %92 = tpu.matmul %90, %91, %cst_29 {dimension_numbers = #tpu.dot_dimension_numbers<[1], [0], [0], [1], [0, 0, 1, 1], [], []>} : vector<16x32xbf16>, vector<32x32xbf16>, vector<16x32xf32> -> vector<16x32xf32>
    %c3 = arith.constant 3 : index
    %c0_30 = arith.constant 0 : index
    %93 = vector.load %arg2[%c3, %c0_30] : memref<18x384xf32, #tpu.memory_space<vmem>>, vector<1x32xf32>
    %94 = vector.broadcast %93 : vector<1x32xf32> to vector<16x32xf32>
    %95 = arith.addf %92, %94 : vector<16x32xf32>
    %96 = arith.addf %95, %23 : vector<16x32xf32>
    %c4 = arith.constant 4 : index
    %c0_31 = arith.constant 0 : index
    %97 = vector.load %arg2[%c4, %c0_31] : memref<18x384xf32, #tpu.memory_space<vmem>>, vector<1x32xf32>
    %c5 = arith.constant 5 : index
    %c0_32 = arith.constant 0 : index
    %98 = vector.load %arg2[%c5, %c0_32] : memref<18x384xf32, #tpu.memory_space<vmem>>, vector<1x32xf32>
    %cst_33 = arith.constant dense<0.000000e+00> : vector<16xf32>
    %99 = vector.multi_reduction <add>, %96, %cst_33 [1] : vector<16x32xf32> to vector<16xf32>
    %100 = vector.shape_cast %99 : vector<16xf32> to vector<16x1xf32>
    %cst_34 = arith.constant 3.200000e+01 : f32
    %101 = vector.broadcast %cst_34 : f32 to vector<16x1xf32>
    %102 = arith.divf %100, %101 : vector<16x1xf32>
    %103 = vector.broadcast %102 : vector<16x1xf32> to vector<16x32xf32>
    %104 = arith.subf %96, %103 : vector<16x32xf32>
    %105 = arith.mulf %104, %104 : vector<16x32xf32>
    %cst_35 = arith.constant dense<0.000000e+00> : vector<16xf32>
    %106 = vector.multi_reduction <add>, %105, %cst_35 [1] : vector<16x32xf32> to vector<16xf32>
    %107 = vector.shape_cast %106 : vector<16xf32> to vector<16x1xf32>
    %cst_36 = arith.constant 3.200000e+01 : f32
    %108 = vector.broadcast %cst_36 : f32 to vector<16x1xf32>
    %109 = arith.divf %107, %108 : vector<16x1xf32>
    %cst_37 = arith.constant 9.99999996E-13 : f32
    %110 = vector.broadcast %cst_37 : f32 to vector<16x1xf32>
    %111 = arith.addf %109, %110 : vector<16x1xf32>
    %112 = math.rsqrt %111 : vector<16x1xf32>
    %113 = vector.broadcast %112 : vector<16x1xf32> to vector<16x32xf32>
    %114 = arith.mulf %104, %113 : vector<16x32xf32>
    %115 = vector.broadcast %97 : vector<1x32xf32> to vector<16x32xf32>
    %116 = arith.mulf %114, %115 : vector<16x32xf32>
    %117 = vector.broadcast %98 : vector<1x32xf32> to vector<16x32xf32>
    %118 = arith.addf %116, %117 : vector<16x32xf32>
    %119 = arith.truncf %118 : vector<16x32xf32> to vector<16x32xbf16>
    %c64 = arith.constant 64 : index
    %c0_38 = arith.constant 0 : index
    %120 = vector.load %arg1[%c64, %c0_38] : memref<384x384xbf16, #tpu.memory_space<vmem>>, vector<32x64xbf16>
    %cst_39 = arith.constant dense<0.000000e+00> : vector<16x64xf32>
    %121 = tpu.matmul %119, %120, %cst_39 {dimension_numbers = #tpu.dot_dimension_numbers<[1], [0], [0], [1], [0, 0, 1, 1], [], []>} : vector<16x32xbf16>, vector<32x64xbf16>, vector<16x64xf32> -> vector<16x64xf32>
    %c6 = arith.constant 6 : index
    %c0_40 = arith.constant 0 : index
    %122 = vector.load %arg2[%c6, %c0_40] : memref<18x384xf32, #tpu.memory_space<vmem>>, vector<1x64xf32>
    %123 = vector.broadcast %122 : vector<1x64xf32> to vector<16x64xf32>
    %124 = arith.addf %121, %123 : vector<16x64xf32>
    %cst_41 = arith.constant 5.000000e-01 : f32
    %125 = vector.broadcast %cst_41 : f32 to vector<16x64xf32>
    %126 = arith.mulf %125, %124 : vector<16x64xf32>
    %cst_42 = arith.constant 4.471500e-02 : f32
    %127 = vector.broadcast %cst_42 : f32 to vector<16x64xf32>
    %128 = arith.mulf %127, %124 : vector<16x64xf32>
    %129 = arith.mulf %128, %124 : vector<16x64xf32>
    %130 = arith.mulf %129, %124 : vector<16x64xf32>
    %131 = arith.addf %124, %130 : vector<16x64xf32>
    %cst_43 = arith.constant 0.797884583 : f32
    %132 = vector.broadcast %cst_43 : f32 to vector<16x64xf32>
    %133 = arith.mulf %132, %131 : vector<16x64xf32>
    %134 = math.tanh %133 : vector<16x64xf32>
    %cst_44 = arith.constant 1.000000e+00 : f32
    %135 = vector.broadcast %cst_44 : f32 to vector<16x64xf32>
    %136 = arith.addf %135, %134 : vector<16x64xf32>
    %137 = arith.mulf %126, %136 : vector<16x64xf32>
    %138 = arith.truncf %137 : vector<16x64xf32> to vector<16x64xbf16>
    %c96 = arith.constant 96 : index
    %c0_45 = arith.constant 0 : index
    %139 = vector.load %arg1[%c96, %c0_45] : memref<384x384xbf16, #tpu.memory_space<vmem>>, vector<64x32xbf16>
    %cst_46 = arith.constant dense<0.000000e+00> : vector<16x32xf32>
    %140 = tpu.matmul %138, %139, %cst_46 {dimension_numbers = #tpu.dot_dimension_numbers<[1], [0], [0], [1], [0, 0, 1, 1], [], []>} : vector<16x64xbf16>, vector<64x32xbf16>, vector<16x32xf32> -> vector<16x32xf32>
    %c7 = arith.constant 7 : index
    %c0_47 = arith.constant 0 : index
    %141 = vector.load %arg2[%c7, %c0_47] : memref<18x384xf32, #tpu.memory_space<vmem>>, vector<1x32xf32>
    %142 = vector.broadcast %141 : vector<1x32xf32> to vector<16x32xf32>
    %143 = arith.addf %140, %142 : vector<16x32xf32>
    %144 = arith.addf %143, %118 : vector<16x32xf32>
    %c8 = arith.constant 8 : index
    %c0_48 = arith.constant 0 : index
    %145 = vector.load %arg2[%c8, %c0_48] : memref<18x384xf32, #tpu.memory_space<vmem>>, vector<1x32xf32>
    %c9 = arith.constant 9 : index
    %c0_49 = arith.constant 0 : index
    %146 = vector.load %arg2[%c9, %c0_49] : memref<18x384xf32, #tpu.memory_space<vmem>>, vector<1x32xf32>
    %cst_50 = arith.constant dense<0.000000e+00> : vector<16xf32>
    %147 = vector.multi_reduction <add>, %144, %cst_50 [1] : vector<16x32xf32> to vector<16xf32>
    %148 = vector.shape_cast %147 : vector<16xf32> to vector<16x1xf32>
    %cst_51 = arith.constant 3.200000e+01 : f32
    %149 = vector.broadcast %cst_51 : f32 to vector<16x1xf32>
    %150 = arith.divf %148, %149 : vector<16x1xf32>
    %151 = vector.broadcast %150 : vector<16x1xf32> to vector<16x32xf32>
    %152 = arith.subf %144, %151 : vector<16x32xf32>
    %153 = arith.mulf %152, %152 : vector<16x32xf32>
    %cst_52 = arith.constant dense<0.000000e+00> : vector<16xf32>
    %154 = vector.multi_reduction <add>, %153, %cst_52 [1] : vector<16x32xf32> to vector<16xf32>
    %155 = vector.shape_cast %154 : vector<16xf32> to vector<16x1xf32>
    %cst_53 = arith.constant 3.200000e+01 : f32
    %156 = vector.broadcast %cst_53 : f32 to vector<16x1xf32>
    %157 = arith.divf %155, %156 : vector<16x1xf32>
    %cst_54 = arith.constant 9.99999996E-13 : f32
    %158 = vector.broadcast %cst_54 : f32 to vector<16x1xf32>
    %159 = arith.addf %157, %158 : vector<16x1xf32>
    %160 = math.rsqrt %159 : vector<16x1xf32>
    %161 = vector.broadcast %160 : vector<16x1xf32> to vector<16x32xf32>
    %162 = arith.mulf %152, %161 : vector<16x32xf32>
    %163 = vector.broadcast %145 : vector<1x32xf32> to vector<16x32xf32>
    %164 = arith.mulf %162, %163 : vector<16x32xf32>
    %165 = vector.broadcast %146 : vector<1x32xf32> to vector<16x32xf32>
    %166 = arith.addf %164, %165 : vector<16x32xf32>
    %167 = arith.truncf %166 : vector<16x32xf32> to vector<16x32xbf16>
    %c160 = arith.constant 160 : index
    %c0_55 = arith.constant 0 : index
    %168 = vector.load %arg1[%c160, %c0_55] : memref<384x384xbf16, #tpu.memory_space<vmem>>, vector<32x384xbf16>
    %cst_56 = arith.constant dense<0.000000e+00> : vector<16x384xf32>
    %169 = tpu.matmul %167, %168, %cst_56 {dimension_numbers = #tpu.dot_dimension_numbers<[1], [0], [0], [1], [0, 0, 1, 1], [], []>} : vector<16x32xbf16>, vector<32x384xbf16>, vector<16x384xf32> -> vector<16x384xf32>
    %c10 = arith.constant 10 : index
    %c0_57 = arith.constant 0 : index
    %170 = vector.load %arg2[%c10, %c0_57] : memref<18x384xf32, #tpu.memory_space<vmem>>, vector<1x384xf32>
    %171 = vector.broadcast %170 : vector<1x384xf32> to vector<16x384xf32>
    %172 = arith.addf %169, %171 : vector<16x384xf32>
    %173 = vector.extract_strided_slice %172 {offsets = [0, 0], sizes = [16, 32], strides = [1, 1]} : vector<16x384xf32> to vector<16x32xf32>
    %cst_58 = arith.constant 2.500000e-01 : f32
    %174 = vector.broadcast %cst_58 : f32 to vector<16x32xf32>
    %175 = arith.mulf %173, %174 : vector<16x32xf32>
    %176 = vector.extract_strided_slice %172 {offsets = [0, 128], sizes = [16, 32], strides = [1, 1]} : vector<16x384xf32> to vector<16x32xf32>
    %177 = vector.extract_strided_slice %172 {offsets = [0, 256], sizes = [16, 32], strides = [1, 1]} : vector<16x384xf32> to vector<16x32xf32>
    %178 = arith.truncf %176 : vector<16x32xf32> to vector<16x32xbf16>
    %cst_59 = arith.constant 0.000000e+00 : f32
    %179 = vector.broadcast %cst_59 : f32 to vector<16x32xf32>
    %cst_60 = arith.constant 0.000000e+00 : f32
    %180 = vector.broadcast %cst_60 : f32 to vector<16x32xf32>
    %181 = arith.select %29, %175, %180 : vector<16x32xi1>, vector<16x32xf32>
    %182 = arith.truncf %181 : vector<16x32xf32> to vector<16x32xbf16>
    %cst_61 = arith.constant dense<0.000000e+00> : vector<16x16xf32>
    %183 = tpu.matmul %182, %178, %cst_61 {dimension_numbers = #tpu.dot_dimension_numbers<[1], [1], [0], [0], [0, 0, 1, 0], [], []>} : vector<16x32xbf16>, vector<16x32xbf16>, vector<16x16xf32> -> vector<16x16xf32>
    %184 = arith.addf %183, %1 : vector<16x16xf32>
    %cst_62 = arith.constant dense<0xFF800000> : vector<16xf32>
    %185 = vector.multi_reduction <maximumf>, %184, %cst_62 [1] : vector<16x16xf32> to vector<16xf32>
    %186 = vector.shape_cast %185 : vector<16xf32> to vector<16x1xf32>
    %187 = vector.broadcast %186 : vector<16x1xf32> to vector<16x16xf32>
    %188 = arith.subf %184, %187 : vector<16x16xf32>
    %189 = math.exp %188 : vector<16x16xf32>
    %cst_63 = arith.constant dense<0.000000e+00> : vector<16xf32>
    %190 = vector.multi_reduction <add>, %189, %cst_63 [1] : vector<16x16xf32> to vector<16xf32>
    %191 = vector.shape_cast %190 : vector<16xf32> to vector<16x1xf32>
    %192 = tpu.reciprocal %191 {approx = true} : vector<16x1xf32> -> vector<16x1xf32>
    %193 = vector.broadcast %192 : vector<16x1xf32> to vector<16x16xf32>
    %194 = arith.mulf %189, %193 : vector<16x16xf32>
    %cst_64 = arith.constant 0.000000e+00 : f32
    %195 = vector.broadcast %cst_64 : f32 to vector<16x32xf32>
    %196 = arith.select %29, %177, %195 : vector<16x32xi1>, vector<16x32xf32>
    %197 = arith.truncf %196 : vector<16x32xf32> to vector<16x32xbf16>
    %198 = arith.truncf %194 : vector<16x16xf32> to vector<16x16xbf16>
    %cst_65 = arith.constant dense<0.000000e+00> : vector<16x32xf32>
    %199 = tpu.matmul %198, %197, %cst_65 {dimension_numbers = #tpu.dot_dimension_numbers<[1], [0], [0], [1], [0, 0, 1, 1], [], []>} : vector<16x16xbf16>, vector<16x32xbf16>, vector<16x32xf32> -> vector<16x32xf32>
    %200 = arith.addf %179, %199 : vector<16x32xf32>
    %cst_66 = arith.constant 0.000000e+00 : f32
    %201 = vector.broadcast %cst_66 : f32 to vector<16x32xf32>
    %202 = arith.select %34, %175, %201 : vector<16x32xi1>, vector<16x32xf32>
    %203 = arith.truncf %202 : vector<16x32xf32> to vector<16x32xbf16>
    %cst_67 = arith.constant dense<0.000000e+00> : vector<16x16xf32>
    %204 = tpu.matmul %203, %178, %cst_67 {dimension_numbers = #tpu.dot_dimension_numbers<[1], [1], [0], [0], [0, 0, 1, 0], [], []>} : vector<16x32xbf16>, vector<16x32xbf16>, vector<16x16xf32> -> vector<16x16xf32>
    %205 = arith.addf %204, %1 : vector<16x16xf32>
    %cst_68 = arith.constant dense<0xFF800000> : vector<16xf32>
    %206 = vector.multi_reduction <maximumf>, %205, %cst_68 [1] : vector<16x16xf32> to vector<16xf32>
    %207 = vector.shape_cast %206 : vector<16xf32> to vector<16x1xf32>
    %208 = vector.broadcast %207 : vector<16x1xf32> to vector<16x16xf32>
    %209 = arith.subf %205, %208 : vector<16x16xf32>
    %210 = math.exp %209 : vector<16x16xf32>
    %cst_69 = arith.constant dense<0.000000e+00> : vector<16xf32>
    %211 = vector.multi_reduction <add>, %210, %cst_69 [1] : vector<16x16xf32> to vector<16xf32>
    %212 = vector.shape_cast %211 : vector<16xf32> to vector<16x1xf32>
    %213 = tpu.reciprocal %212 {approx = true} : vector<16x1xf32> -> vector<16x1xf32>
    %214 = vector.broadcast %213 : vector<16x1xf32> to vector<16x16xf32>
    %215 = arith.mulf %210, %214 : vector<16x16xf32>
    %cst_70 = arith.constant 0.000000e+00 : f32
    %216 = vector.broadcast %cst_70 : f32 to vector<16x32xf32>
    %217 = arith.select %34, %177, %216 : vector<16x32xi1>, vector<16x32xf32>
    %218 = arith.truncf %217 : vector<16x32xf32> to vector<16x32xbf16>
    %219 = arith.truncf %215 : vector<16x16xf32> to vector<16x16xbf16>
    %cst_71 = arith.constant dense<0.000000e+00> : vector<16x32xf32>
    %220 = tpu.matmul %219, %218, %cst_71 {dimension_numbers = #tpu.dot_dimension_numbers<[1], [0], [0], [1], [0, 0, 1, 1], [], []>} : vector<16x16xbf16>, vector<16x32xbf16>, vector<16x32xf32> -> vector<16x32xf32>
    %221 = arith.addf %200, %220 : vector<16x32xf32>
    %222 = arith.truncf %221 : vector<16x32xf32> to vector<16x32xbf16>
    %c192 = arith.constant 192 : index
    %c0_72 = arith.constant 0 : index
    %223 = vector.load %arg1[%c192, %c0_72] : memref<384x384xbf16, #tpu.memory_space<vmem>>, vector<32x32xbf16>
    %cst_73 = arith.constant dense<0.000000e+00> : vector<16x32xf32>
    %224 = tpu.matmul %222, %223, %cst_73 {dimension_numbers = #tpu.dot_dimension_numbers<[1], [0], [0], [1], [0, 0, 1, 1], [], []>} : vector<16x32xbf16>, vector<32x32xbf16>, vector<16x32xf32> -> vector<16x32xf32>
    %c11 = arith.constant 11 : index
    %c0_74 = arith.constant 0 : index
    %225 = vector.load %arg2[%c11, %c0_74] : memref<18x384xf32, #tpu.memory_space<vmem>>, vector<1x32xf32>
    %226 = vector.broadcast %225 : vector<1x32xf32> to vector<16x32xf32>
    %227 = arith.addf %224, %226 : vector<16x32xf32>
    %228 = arith.addf %227, %166 : vector<16x32xf32>
    %c12 = arith.constant 12 : index
    %c0_75 = arith.constant 0 : index
    %229 = vector.load %arg2[%c12, %c0_75] : memref<18x384xf32, #tpu.memory_space<vmem>>, vector<1x32xf32>
    %c13 = arith.constant 13 : index
    %c0_76 = arith.constant 0 : index
    %230 = vector.load %arg2[%c13, %c0_76] : memref<18x384xf32, #tpu.memory_space<vmem>>, vector<1x32xf32>
    %cst_77 = arith.constant dense<0.000000e+00> : vector<16xf32>
    %231 = vector.multi_reduction <add>, %228, %cst_77 [1] : vector<16x32xf32> to vector<16xf32>
    %232 = vector.shape_cast %231 : vector<16xf32> to vector<16x1xf32>
    %cst_78 = arith.constant 3.200000e+01 : f32
    %233 = vector.broadcast %cst_78 : f32 to vector<16x1xf32>
    %234 = arith.divf %232, %233 : vector<16x1xf32>
    %235 = vector.broadcast %234 : vector<16x1xf32> to vector<16x32xf32>
    %236 = arith.subf %228, %235 : vector<16x32xf32>
    %237 = arith.mulf %236, %236 : vector<16x32xf32>
    %cst_79 = arith.constant dense<0.000000e+00> : vector<16xf32>
    %238 = vector.multi_reduction <add>, %237, %cst_79 [1] : vector<16x32xf32> to vector<16xf32>
    %239 = vector.shape_cast %238 : vector<16xf32> to vector<16x1xf32>
    %cst_80 = arith.constant 3.200000e+01 : f32
    %240 = vector.broadcast %cst_80 : f32 to vector<16x1xf32>
    %241 = arith.divf %239, %240 : vector<16x1xf32>
    %cst_81 = arith.constant 9.99999996E-13 : f32
    %242 = vector.broadcast %cst_81 : f32 to vector<16x1xf32>
    %243 = arith.addf %241, %242 : vector<16x1xf32>
    %244 = math.rsqrt %243 : vector<16x1xf32>
    %245 = vector.broadcast %244 : vector<16x1xf32> to vector<16x32xf32>
    %246 = arith.mulf %236, %245 : vector<16x32xf32>
    %247 = vector.broadcast %229 : vector<1x32xf32> to vector<16x32xf32>
    %248 = arith.mulf %246, %247 : vector<16x32xf32>
    %249 = vector.broadcast %230 : vector<1x32xf32> to vector<16x32xf32>
    %250 = arith.addf %248, %249 : vector<16x32xf32>
    %251 = arith.truncf %250 : vector<16x32xf32> to vector<16x32xbf16>
    %c224 = arith.constant 224 : index
    %c0_82 = arith.constant 0 : index
    %252 = vector.load %arg1[%c224, %c0_82] : memref<384x384xbf16, #tpu.memory_space<vmem>>, vector<32x64xbf16>
    %cst_83 = arith.constant dense<0.000000e+00> : vector<16x64xf32>
    %253 = tpu.matmul %251, %252, %cst_83 {dimension_numbers = #tpu.dot_dimension_numbers<[1], [0], [0], [1], [0, 0, 1, 1], [], []>} : vector<16x32xbf16>, vector<32x64xbf16>, vector<16x64xf32> -> vector<16x64xf32>
    %c14 = arith.constant 14 : index
    %c0_84 = arith.constant 0 : index
    %254 = vector.load %arg2[%c14, %c0_84] : memref<18x384xf32, #tpu.memory_space<vmem>>, vector<1x64xf32>
    %255 = vector.broadcast %254 : vector<1x64xf32> to vector<16x64xf32>
    %256 = arith.addf %253, %255 : vector<16x64xf32>
    %cst_85 = arith.constant 5.000000e-01 : f32
    %257 = vector.broadcast %cst_85 : f32 to vector<16x64xf32>
    %258 = arith.mulf %257, %256 : vector<16x64xf32>
    %cst_86 = arith.constant 4.471500e-02 : f32
    %259 = vector.broadcast %cst_86 : f32 to vector<16x64xf32>
    %260 = arith.mulf %259, %256 : vector<16x64xf32>
    %261 = arith.mulf %260, %256 : vector<16x64xf32>
    %262 = arith.mulf %261, %256 : vector<16x64xf32>
    %263 = arith.addf %256, %262 : vector<16x64xf32>
    %cst_87 = arith.constant 0.797884583 : f32
    %264 = vector.broadcast %cst_87 : f32 to vector<16x64xf32>
    %265 = arith.mulf %264, %263 : vector<16x64xf32>
    %266 = math.tanh %265 : vector<16x64xf32>
    %cst_88 = arith.constant 1.000000e+00 : f32
    %267 = vector.broadcast %cst_88 : f32 to vector<16x64xf32>
    %268 = arith.addf %267, %266 : vector<16x64xf32>
    %269 = arith.mulf %258, %268 : vector<16x64xf32>
    %270 = arith.truncf %269 : vector<16x64xf32> to vector<16x64xbf16>
    %c256 = arith.constant 256 : index
    %c0_89 = arith.constant 0 : index
    %271 = vector.load %arg1[%c256, %c0_89] : memref<384x384xbf16, #tpu.memory_space<vmem>>, vector<64x32xbf16>
    %cst_90 = arith.constant dense<0.000000e+00> : vector<16x32xf32>
    %272 = tpu.matmul %270, %271, %cst_90 {dimension_numbers = #tpu.dot_dimension_numbers<[1], [0], [0], [1], [0, 0, 1, 1], [], []>} : vector<16x64xbf16>, vector<64x32xbf16>, vector<16x32xf32> -> vector<16x32xf32>
    %c15 = arith.constant 15 : index
    %c0_91 = arith.constant 0 : index
    %273 = vector.load %arg2[%c15, %c0_91] : memref<18x384xf32, #tpu.memory_space<vmem>>, vector<1x32xf32>
    %274 = vector.broadcast %273 : vector<1x32xf32> to vector<16x32xf32>
    %275 = arith.addf %272, %274 : vector<16x32xf32>
    %276 = arith.addf %275, %250 : vector<16x32xf32>
    %c16_92 = arith.constant 16 : index
    %c0_93 = arith.constant 0 : index
    %277 = vector.load %arg2[%c16_92, %c0_93] : memref<18x384xf32, #tpu.memory_space<vmem>>, vector<1x32xf32>
    %c17 = arith.constant 17 : index
    %c0_94 = arith.constant 0 : index
    %278 = vector.load %arg2[%c17, %c0_94] : memref<18x384xf32, #tpu.memory_space<vmem>>, vector<1x32xf32>
    %cst_95 = arith.constant dense<0.000000e+00> : vector<16xf32>
    %279 = vector.multi_reduction <add>, %276, %cst_95 [1] : vector<16x32xf32> to vector<16xf32>
    %280 = vector.shape_cast %279 : vector<16xf32> to vector<16x1xf32>
    %cst_96 = arith.constant 3.200000e+01 : f32
    %281 = vector.broadcast %cst_96 : f32 to vector<16x1xf32>
    %282 = arith.divf %280, %281 : vector<16x1xf32>
    %283 = vector.broadcast %282 : vector<16x1xf32> to vector<16x32xf32>
    %284 = arith.subf %276, %283 : vector<16x32xf32>
    %285 = arith.mulf %284, %284 : vector<16x32xf32>
    %cst_97 = arith.constant dense<0.000000e+00> : vector<16xf32>
    %286 = vector.multi_reduction <add>, %285, %cst_97 [1] : vector<16x32xf32> to vector<16xf32>
    %287 = vector.shape_cast %286 : vector<16xf32> to vector<16x1xf32>
    %cst_98 = arith.constant 3.200000e+01 : f32
    %288 = vector.broadcast %cst_98 : f32 to vector<16x1xf32>
    %289 = arith.divf %287, %288 : vector<16x1xf32>
    %cst_99 = arith.constant 9.99999996E-13 : f32
    %290 = vector.broadcast %cst_99 : f32 to vector<16x1xf32>
    %291 = arith.addf %289, %290 : vector<16x1xf32>
    %292 = math.rsqrt %291 : vector<16x1xf32>
    %293 = vector.broadcast %292 : vector<16x1xf32> to vector<16x32xf32>
    %294 = arith.mulf %284, %293 : vector<16x32xf32>
    %295 = vector.broadcast %277 : vector<1x32xf32> to vector<16x32xf32>
    %296 = arith.mulf %294, %295 : vector<16x32xf32>
    %297 = vector.broadcast %278 : vector<1x32xf32> to vector<16x32xf32>
    %298 = arith.addf %296, %297 : vector<16x32xf32>
    %c0_100 = arith.constant 0 : index
    %c0_101 = arith.constant 0 : index
    %299 = vector.load %arg4[%c0_100, %c0_101] : memref<16x32xf32, #tpu.memory_space<vmem>>, vector<16x32xf32>
    tpu.vector_store %arg4[%c0_100, %c0_101], %298 {strides = array<i32>} : memref<16x32xf32, #tpu.memory_space<vmem>>, vector<16x32xf32>,
    %c6_102 = arith.constant 6 : index
    %c0_103 = arith.constant 0 : index
    %300 = tpu.strided_load %arg4[%c6_102, %c0_103] {strides = array<i32: 8, 1>} : memref<16x32xf32, #tpu.memory_space<vmem>>, vector<2x32xf32>
    %c7_104 = arith.constant 7 : index
    %c0_105 = arith.constant 0 : index
    %301 = tpu.strided_load %arg4[%c7_104, %c0_105] {strides = array<i32: 8, 1>} : memref<16x32xf32, #tpu.memory_space<vmem>>, vector<2x32xf32>
    %c320 = arith.constant 320 : index
    %c0_106 = arith.constant 0 : index
    %302 = vector.load %arg1[%c320, %c0_106] : memref<384x384xbf16, #tpu.memory_space<vmem>>, vector<32x16xbf16>
    %c352 = arith.constant 352 : index
    %c0_107 = arith.constant 0 : index
    %303 = vector.load %arg1[%c352, %c0_107] : memref<384x384xbf16, #tpu.memory_space<vmem>>, vector<32x16xbf16>
    %304 = arith.truncf %300 : vector<2x32xf32> to vector<2x32xbf16>
    %cst_108 = arith.constant dense<0.000000e+00> : vector<2x16xf32>
    %305 = tpu.matmul %304, %302, %cst_108 {dimension_numbers = #tpu.dot_dimension_numbers<[1], [0], [0], [1], [0, 0, 1, 1], [], []>} : vector<2x32xbf16>, vector<32x16xbf16>, vector<2x16xf32> -> vector<2x16xf32>
    %306 = arith.truncf %301 : vector<2x32xf32> to vector<2x32xbf16>
    %cst_109 = arith.constant dense<0.000000e+00> : vector<2x16xf32>
    %307 = tpu.matmul %306, %303, %cst_109 {dimension_numbers = #tpu.dot_dimension_numbers<[1], [0], [0], [1], [0, 0, 1, 1], [], []>} : vector<2x32xbf16>, vector<32x16xbf16>, vector<2x16xf32> -> vector<2x16xf32>
    %308 = arith.addf %305, %307 : vector<2x16xf32>
    %c0_110 = arith.constant 0 : index
    %c0_111 = arith.constant 0 : index
    %309 = vector.load %arg3[%c0_110, %c0_111] : memref<2x16xf32, #tpu.memory_space<vmem>>, vector<2x16xf32>
    tpu.vector_store %arg3[%c0_110, %c0_111], %308 {strides = array<i32>} : memref<2x16xf32, #tpu.memory_space<vmem>>, vector<2x16xf32>,
    return
  }
}

</mosaic_0001>

<bundles_post_ra>
// kernel: euar_bert_forward.1
= control target key start
LH: loop header
LB: loop body
LE: loop exit
PB: predicated region body
PF: predicated region fallthrough
CT: control target
= control target key end

     0   :  { %vm22_vm0 = vcmask 261120   ;;  %s2372_s0 = inlined_call_operand.vmem [shape: f32[32,32], index: 0, kind: input, shape index: {}]   ;;  %s2373_s1 = inlined_call_operand.vmem [shape: bf16[384,384], index: 1, kind: input, shape index: {}]   ;;  %s2374_s2 = inlined_call_operand.vmem [shape: f32[18,384], index: 2, kind: input, shape index: {}]   ;;  %s2375_s3 = inlined_call_operand.hbm [shape: f32[2,16], index: 3, kind: output, shape index: {}]  }
   0x1   :  { %v16_v0 = vld [vmem:[%s2372_s0] sm:$0xff]  ;;  %v17_v1 = vld [vmem:[%s2372_s0 + $0x8] sm:$0xff] }
   0x2   :  { %v23_v2 = vsel %vm22_vm0, %v16_v0, 0.0  ;;  %v26_v3 = vsel %vm22_vm0, %v17_v1, 0.0 }
   0x3   :  { %24 = vadd.xlane.f32.xlu0 %v23_v2 }
   0x7   :  { %27 = vadd.xlane.f32.xlu0 %v26_v3 }
   0x8   :  { %8 = vsyncpa [#allocation4], 0  ;;  %v1822_v14 = vld [vmem:[%s2373_s1 + $0x4] ss:$12 sps:$4 sm:$0xff]   ;;  %v1824_v15 = vld [vmem:[%s2373_s1] ss:$12 sps:$4 sm:$0xff]   ;;  %v54_v39 = vlaneseq }
   0x9   :  { %v1825_v16 = vld [vmem:[%s2373_s1 + $0x8] ss:$12 sps:$4 sm:$0xff]   ;;  %124 = vmatprep.subr.bf16.mxu0 %v1822_v14  ;;  %v1942_v17 = vmov 0.0   ;;  %v1828_v19 = vld [vmem:[%s2373_s1 + $0x18] ss:$12 sps:$4 sm:$0xff]   ;;  %v1943_v21 = vmov 0  }
   0xa   :  { %1670 = vmatprep.subr.bf16.mxu1 %v1942_v17  ;;  %v1826_v18 = vld [vmem:[%s2373_s1 + $0x1c] ss:$12 sps:$4 sm:$0xff]   ;;  %125 = vmatpush1.bf16.msra.mxu0 %v1824_v15  ;;  %v1829_v20 = vld [vmem:[%s2373_s1 + $0x20] ss:$12 sps:$4 sm:$0xff]   ;;  %vm1944_vm1 = vmmov 0   ;;  %v2019_v40 = vshrl.u32 %v54_v39, 7 }
   0xb   :  { %1671 = vmatpush3.bf16.msra.mxu1 %v1825_v16  ;;  %126 = vmatprep.subr.bf16.mxu0 %v1826_v18  ;;  %v20_v30 = vld [vmem:[%s2374_s2] ss:$0 sm:$0xff]  ;;  %v21_v34 = vld [vmem:[%s2374_s2 + $0x1] ss:$0 sm:$0xff]  ;;  %v2027_v45 = vand.u32 127, %v54_v39  ;;  %v2079_v14 = vld [vmem:[%s2372_s0 + $0x18] sm:$0xff] }
   0xc   :  { %1672 = vmatprep.subr.bf16.mxu1 %v1942_v17  ;;  %156 = vmatprep.mubr.bf16.mxu0 %v1943_v21  ;;  %v76_v41 = vsub.s32 0, %v2019_v40  ;;  %v1554_v42 = vld [vmem:[%s2374_s2 + $0x2] ss:$8 sm:$0x7]  ;;  %v84_v43 = vsub.s32 2, %v2019_v40  ;;  %v80_v44 = vsub.s32 1, %v2019_v40 }
   0xd   :  { %1674 = vmatprep.mubr.msk.bf16.mxu1 %vm1944_vm1, %v1942_v17  ;;  %vm59_vm2 = vcmp.ge.s32.totalorder %v2027_v45, 16  ;;  %vm60_vm3 = vcmp.lt.s32.totalorder %v2027_v45, 32  ;;  %vm57_vm4 = vcmp.lt.s32.totalorder %v2027_v45, 16  ;;  %vm261_vm7 = vcmask 130048   ;;  %s1945_s8 = smov [#allocation3]  }
   0xe   :  { %127 = vmatpush1.bf16.msra.mxu0 %v1828_v19  ;;  %v77_v46 = vrot.slane %v1554_v42, %v76_v41  ;;  %v85_v47 = vrot.slane %v1554_v42, %v84_v43  ;;  %v81_v50 = vrot.slane %v1554_v42, %v80_v44  ;;  %vm2038_vm5 = vmand %vm59_vm2, %vm60_vm3  ;;  %vm659_vm9 = vcmask 523264   ;;  %s1546_s9 = sshll.u32 %s1945_s8, 4  ;;  %s1547_s9 = int_to_ptr.vmem [resolvable:$true] %s1546_s9 }
   0xf   :  { %1673 = vmatpush3.bf16.msra.mxu1 %v1829_v20  ;;  %1678 = vmatprep.subr.bf16.mxu0 %v1942_v17  ;;  %vm1565_vm6 = vmpackc.low %vm2038_vm5, %vm2038_vm5  ;;  %vm1538_vm10 = vcmask 123904   ;;  %s1918_s10 = scalar_lea.vmem %s1547_s9, 32  ;;  %p1923_p1 = scmp.lt.s32.totalorder %s1547_s9, %s1547_s9 }
  0x10   :  { %1684 = vmatprep.subr.bf16.mxu1 %v1942_v17  ;;  %vm2100_vm8 = vmpackc.low %vm57_vm4, %vm57_vm4  ;;  %p1919_p0 = scmp.ne.s32.totalorder %s1547_s9, %s1918_s10  ;;  %p1924_p2 = scmp.lt.s32.totalorder %s1918_s10, %s1918_s10 }
  0x12   :  { %p1925_p3 = por %p1924_p2, %p1923_p1 }
  0x14   :  { %p1926_p4 = pnand %p1925_p3, %p1919_p0 }
  0x90   :  { %v25_v4 = vpop.xlane.xlu0 %24 }
  0x91   :  { %v30_v5 = vmul.f32 0.03125, %v25_v4 }
  0x93   :  { %v32_v6 = vsub.f32 %v16_v0, %v30_v5 }
  0x94   :  { %v28_v7 = vpop.xlane.xlu0 %27 }
  0x95   :  { %v31_v8 = vmul.f32 0.03125, %v28_v7  ;;  %v34_v9 = vmul.f32 %v32_v6, %v32_v6 }
  0x97   :  { %v33_v10 = vsub.f32 %v17_v1, %v31_v8  ;;  %v36_v11 = vsel %vm22_vm0, %v34_v9, 0.0 }
  0x98   :  { %37 = vadd.xlane.f32.xlu1 %v36_v11  ;;  %v2074_v11 = vld [vmem:[%s2372_s0 + $0x10] sm:$0xff] }
  0x99   :  { %v35_v12 = vmul.f32 %v33_v10, %v33_v10 }
  0x9b   :  { %v39_v13 = vsel %vm22_vm0, %v35_v12, 0.0 }
  0x9c   :  { %40 = vadd.xlane.f32.xlu1 %v39_v13 }
 0x125   :  { %v38_v22 = vpop.xlane.xlu1 %37 }
 0x126   :  { %v42_v23 = vmul.f32 0.03125, %v38_v22 }
 0x128   :  { %v44_v24 = vadd.f32 1e-12, %v42_v23 }
 0x129   :  { %v41_v25 = vpop.xlane.xlu1 %40 }
 0x12a   :  { %1858 = vrsqrt.f32 %v44_v24  ;;  %v43_v26 = vmul.f32 0.03125, %v41_v25 }
 0x12c   :  { %v45_v27 = vadd.f32 1e-12, %v43_v26 }
 0x12e   :  { %1860 = vrsqrt.f32 %v45_v27 }
 0x134   :  { %v1859_v28 = vpop.eup %1858 }
 0x135   :  { %v48_v29 = vmul.f32 %v1859_v28, %v32_v6 }
 0x137   :  { %v50_v33 = vmul.f32 %v48_v29, %v20_v30 }
 0x138   :  { %v1861_v31 = vpop.eup %1860 }
 0x139   :  { %v49_v32 = vmul.f32 %v1861_v31, %v33_v10  ;;  %v2007_v36 = vadd.f32 %v50_v33, %v21_v34 }
 0x13b   :  { %v51_v35 = vmul.f32 %v49_v32, %v20_v30 }
 0x13d   :  { %v2009_v37 = vadd.f32 %v51_v35, %v21_v34 }
 0x13f   :  { %v62_v38 = vpack.c.bf16 %v2009_v37, %v2007_v36 }
 0x141   :  { %1561 = vmatmul.mubr.msk.bf16.vlgmr.msra.gmra.mrb[0].mxu0 %vm22_vm0, %v62_v38  ;;  %1675 = vmatmul.mubr.msk.bf16.vlgmr.msra.gmra.mrb[0].mxu1 %vm22_vm0, %v62_v38 }
 0x142   :  { %1680 = vmatprep.mubr.msk.bf16.mxu0 %vm1944_vm1, %v1942_v17  ;;  %1686 = vmatprep.mubr.msk.bf16.mxu1 %vm1944_vm1, %v1942_v17 }
 0x214   :  { %v158_v48 = vpop.f32.mrb[0].mxu0  ;;  %v201_v49 = vpop.f32.mrb[0].mxu1 }
 0x215   :  { %v159_v51 = vadd.f32 %v158_v48, %v77_v46  ;;  %v160_v52 = vpop.f32.mrb[1].mxu0  ;;  %v1676_v53 = vpop.f32.mrb[1].mxu1  ;;  %v202_v57 = vadd.f32 %v201_v49, %v85_v47 }
 0x216   :  { %v162_v54 = vpop.f32.mrb[2].mxu0  ;;  %v204_v55 = vpop.f32.mrb[2].mxu1  ;;  %v161_v63 = vadd.f32 %v160_v52, %v81_v50 }
 0x217   :  { %v208_v56 = vmul.f32 0.25, %v159_v51  ;;  %v163_v58 = vadd.f32 %v162_v54, %v77_v46  ;;  %v205_v59 = vadd.f32 %v204_v55, %v85_v47  ;;  %v164_v60 = vpop.f32.mrb[3].mxu0  ;;  %v1677_v61 = vpop.f32.mrb[3].mxu1 }
 0x218   :  { %v165_v0 = vadd.f32 %v164_v60, %v81_v50 }
 0x219   :  { %v209_v1 = vmul.f32 0.25, %v163_v58  ;;  %v2042_v2 = vpack.c.bf16 %v205_v59, %v202_v57  ;;  %v211_v4 = vsel %vm57_vm4, %v208_v56, 0.0  ;;  %v288_v5 = vsel %vm2038_vm5, %v208_v56, 0.0  ;;  %v1830_v58 = vld [vmem:[%s2373_s1 + $0x30] ss:$12 sps:$4 sm:$0xff]  }
 0x21a   :  { %v210_v3 = vpack.c.bf16 %v165_v0, %v161_v63 }
 0x21b   :  { %v212_v6 = vsel %vm57_vm4, %v209_v1, 0.0  ;;  %v289_v7 = vsel %vm2038_vm5, %v209_v1, 0.0 }
 0x21c   :  { %v213_v8 = vpack.c.bf16 %v212_v6, %v211_v4  ;;  %v290_v9 = vpack.c.bf16 %v289_v7, %v288_v5  ;;  %v218_v10 = vsel %vm22_vm0, %v210_v3, 0  ;;  %v1847_v6 = vld [vmem:[%s2373_s1 + $0x138] ss:$12 sps:$4 sm:$0xff]  }
 0x21d   :  { %1679 = vmatpush3.bf16.xpose.msra.mxu0 %v218_v10  ;;  %1685 = vmatpush3.bf16.xpose.msra.mxu1 %v218_v10 }
 0x21e   :  { %1690 = vmatprep.subr.bf16.mxu0 %v1942_v17  ;;  %1702 = vmatprep.subr.bf16.mxu1 %v1942_v17 }
 0x224   :  { %1681 = vmatmul.mubr.msk.bf16.vlgmr.msra.gmra.mrb[4].mxu0 %vm22_vm0, %v213_v8  ;;  %1687 = vmatmul.mubr.msk.bf16.vlgmr.msra.gmra.mrb[4].mxu1 %vm22_vm0, %v290_v9 }
 0x225   :  { %1691 = vmatpush3.bf16.msk.msra.mxu0 %vm1565_vm6, %v2042_v2  ;;  %1692 = vmatprep.mubr.msk.bf16.mxu0 %vm1944_vm1, %v1942_v17 }
 0x226   :  { %1696 = vmatprep.subr.bf16.mxu0 %v1942_v17  ;;  %1706 = vmatprep.mubr.msk.bf16.mxu1 %vm1944_vm1, %v1942_v17 }
 0x227   :  { %1703 = vmatpush3.bf16.msra.mxu1 %v1830_v58 }
 0x228   :  { %1704 = vmatprep.subr.bf16.mxu1 %v1942_v17 }
 0x2f7   :  { %v254_v12 = vpop.f32.mrb[4].mxu0  ;;  %v328_v13 = vpop.f32.mrb[4].mxu1 }
 0x2f8   :  { %v329_v15 = vadd.f32 %v328_v13, %v2074_v11  ;;  %v1682_v16 = vpop.f32.mrb[5].mxu0  ;;  %v1688_v18 = vpop.f32.mrb[5].mxu1  ;;  %v255_v22 = vadd.f32 %v254_v12, %v2074_v11  ;;  %v1831_v13 = vld [vmem:[%s2373_s1 + $0x48] ss:$12 sps:$4 sm:$0xff]  }
 0x2f9   :  { %v257_v19 = vpop.f32.mrb[6].mxu0  ;;  %v331_v20 = vpop.f32.mrb[6].mxu1  ;;  %1705 = vmatpush3.bf16.msra.mxu1 %v1831_v13 }
 0x2fa   :  { %v332_v23 = vadd.f32 %v331_v20, %v2079_v14  ;;  %v1683_v24 = vpop.f32.mrb[7].mxu0  ;;  %v1689_v25 = vpop.f32.mrb[7].mxu1  ;;  %v335_v26 = vsel %vm261_vm7, %v329_v15, -inf  ;;  %v258_v27 = vadd.f32 %v257_v19, %v2079_v14  ;;  %v262_v29 = vsel %vm261_vm7, %v255_v22, -inf  ;;  %1710 = vmatprep.subr.bf16.mxu1 %v1942_v17  ;;  %v454_v20 = vld [vmem:[%s2374_s2 + $0x3] ss:$0 sm:$0xff] }
 0x2fb   :  { %336 = vmax.xlane.f32.xlu0 %v335_v26 }
 0x2fc   :  { %v338_v28 = vsel %vm261_vm7, %v332_v23, -inf  ;;  %v265_v30 = vsel %vm261_vm7, %v258_v27, -inf }
 0x2fd   :  { %339 = vmax.xlane.f32.xlu1 %v338_v28 }
 0x2ff   :  { %263 = vmax.xlane.f32.xlu0 %v262_v29 }
 0x301   :  { %266 = vmax.xlane.f32.xlu1 %v265_v30 }
 0x388   :  { %v337_v31 = vpop.xlane.xlu0 %336 }
 0x389   :  { %v341_v32 = vsub.f32 %v329_v15, %v337_v31 }
 0x38a   :  { %v340_v33 = vpop.xlane.xlu1 %339 }
 0x38b   :  { %v343_v34 = vmul.f32 1.442695, %v341_v32  ;;  %v342_v35 = vsub.f32 %v332_v23, %v340_v33 }
 0x38c   :  { %v264_v38 = vpop.xlane.xlu0 %263 }
 0x38d   :  { %1862 = vpow2.f32 %v343_v34  ;;  %v345_v39 = vmul.f32 1.442695, %v342_v35  ;;  %v268_v42 = vsub.f32 %v255_v22, %v264_v38 }
 0x38e   :  { %v267_v46 = vpop.xlane.xlu1 %266 }
 0x38f   :  { %1864 = vpow2.f32 %v345_v39  ;;  %v270_v47 = vmul.f32 1.442695, %v268_v42  ;;  %v269_v48 = vsub.f32 %v258_v27, %v267_v46 }
 0x391   :  { %1866 = vpow2.f32 %v270_v47  ;;  %v272_v49 = vmul.f32 1.442695, %v269_v48  ;;  %v1833_v48 = vld [vmem:[%s2373_s1 + $0x78] ss:$12 sps:$4 sm:$0xff]  }
 0x393   :  { %1868 = vpow2.f32 %v272_v49 }
 0x397   :  { %v1863_v50 = vpop.eup %1862 }
 0x398   :  { %v347_v51 = vsel %vm261_vm7, %v1863_v50, 0.0 }
 0x399   :  { %v1865_v52 = vpop.eup %1864  ;;  %348 = vadd.xlane.f32.xlu0 %v347_v51 }
 0x39a   :  { %v350_v53 = vsel %vm261_vm7, %v1865_v52, 0.0 }
 0x39b   :  { %v1867_v54 = vpop.eup %1866  ;;  %351 = vadd.xlane.f32.xlu1 %v350_v53 }
 0x39c   :  { %v274_v55 = vsel %vm261_vm7, %v1867_v54, 0.0 }
 0x39d   :  { %v1869_v56 = vpop.eup %1868  ;;  %275 = vadd.xlane.f32.xlu0 %v274_v55 }
 0x39e   :  { %v277_v57 = vsel %vm261_vm7, %v1869_v56, 0.0 }
 0x39f   :  { %278 = vadd.xlane.f32.xlu1 %v277_v57 }
 0x426   :  { %v349_v59 = vpop.xlane.xlu0 %348 }
 0x427   :  { %1870 = vrcp.f32 %v349_v59 }
 0x428   :  { %v352_v60 = vpop.xlane.xlu1 %351 }
 0x429   :  { %1872 = vrcp.f32 %v352_v60 }
 0x42a   :  { %v276_v63 = vpop.xlane.xlu0 %275 }
 0x42c   :  { %v279_v61 = vpop.xlane.xlu1 %278 }
 0x42d   :  { %1874 = vrcp.f32 %v279_v61  ;;  %v514_v61 = vld [vmem:[%s2374_s2 + $0x5] ss:$0 sm:$0xff] }
 0x42e   :  { %1876 = vrcp.f32 %v276_v63 }
 0x431   :  { %v1871_v0 = vpop.eup %1870 }
 0x432   :  { %v355_v3 = vmul.f32 %v1871_v0, %v1863_v50 }
 0x433   :  { %v1873_v1 = vpop.eup %1872 }
 0x434   :  { %v356_v4 = vmul.f32 %v1873_v1, %v1865_v52 }
 0x436   :  { %v360_v5 = vpack.c.bf16 %v356_v4, %v355_v3  ;;  %v1834_v4 = vld [vmem:[%s2373_s1 + $0x90] ss:$12 sps:$4 sm:$0xff]  }
 0x437   :  { %v1875_v7 = vpop.eup %1874 }
 0x438   :  { %1693 = vmatmul.mubr.msk.bf16.vlgmr.msra.gmra.mrb[8].mxu0 %vm261_vm7, %v360_v5  ;;  %v1877_v8 = vpop.eup %1876  ;;  %v283_v9 = vmul.f32 %v1875_v7, %v1869_v56  ;;  %v513_v56 = vld [vmem:[%s2374_s2 + $0x4] ss:$0 sm:$0xff]  ;;  %v1835_v5 = vld [vmem:[%s2373_s1 + $0xa8] ss:$12 sps:$4 sm:$0xff]   ;;  %v1836_v7 = vld [vmem:[%s2373_s1 + $0xc0] ss:$12 sps:$4 sm:$0xff]  }
 0x439   :  { %1697 = vmatpush3.bf16.msk.msra.mxu0 %vm2100_vm8, %v2042_v2  ;;  %1698 = vmatprep.mubr.msk.bf16.mxu0 %vm1944_vm1, %v1942_v17  ;;  %v282_v10 = vmul.f32 %v1877_v8, %v1867_v54  ;;  %v550_v8 = vld [vmem:[%s2374_s2 + $0x6] ss:$0 sm:$0xff] }
 0x43a   :  { %1718 = vmatprep.subr.bf16.mxu0 %v1942_v17 }
 0x43b   :  { %v287_v12 = vpack.c.bf16 %v283_v9, %v282_v10 }
 0x444   :  { %1699 = vmatmul.mubr.msk.bf16.vlgmr.msra.gmra.mrb[8].mxu0 %vm261_vm7, %v287_v12 }
 0x445   :  { %1726 = vmatprep.mubr.msk.bf16.mxu0 %vm1944_vm1, %v1942_v17  ;;  %1719 = vmatpush3.bf16.msra.mxu0 %v1834_v4  ;;  %v1843_v4 = vld [vmem:[%s2373_s1 + $0x10c] ss:$12 sps:$4 sm:$0xff]  }
 0x446   :  { %1720 = vmatprep.subr.bf16.mxu0 %v1942_v17 }
 0x449   :  { %1721 = vmatpush3.bf16.msra.mxu0 %v1835_v5 }
 0x44a   :  { %1722 = vmatprep.subr.bf16.mxu0 %v1942_v17 }
 0x44d   :  { %1723 = vmatpush3.bf16.msra.mxu0 %v1836_v7 }
 0x44e   :  { %1724 = vmatprep.subr.bf16.mxu0 %v1942_v17 }
 0x517   :  { %v442_v2 = vpop.f32.mrb[8].mxu0 }
 0x518   :  { %v1700_v15 = vpop.f32.mrb[9].mxu0 }
 0x519   :  { %v445_v16 = vpop.f32.mrb[10].mxu0 }
 0x51a   :  { %v449_v18 = vpack.c.bf16 %v445_v16, %v442_v2  ;;  %v1701_v19 = vpop.f32.mrb[11].mxu0 }
 0x51c   :  { %1707 = vmatmul.mubr.msk.bf16.vlgmr.msra.gmra.mrb[8].mxu1 %vm22_vm0, %v449_v18 }
 0x51d   :  { %1714 = vmatprep.mubr.msk.bf16.mxu1 %vm1944_vm1, %v1942_v17 }
 0x5ef   :  { %v504_v22 = vpop.f32.mrb[8].mxu1 }
 0x5f0   :  { %v505_v23 = vadd.f32 %v504_v22, %v454_v20  ;;  %v1708_v24 = vpop.f32.mrb[9].mxu1 }
 0x5f1   :  { %v507_v25 = vpop.f32.mrb[10].mxu1 }
 0x5f2   :  { %v508_v26 = vadd.f32 %v507_v25, %v454_v20  ;;  %v1709_v27 = vpop.f32.mrb[11].mxu1  ;;  %v511_v28 = vadd.f32 %v505_v23, %v2007_v36 }
 0x5f4   :  { %v515_v29 = vsel %vm22_vm0, %v511_v28, 0.0  ;;  %v512_v30 = vadd.f32 %v508_v26, %v2009_v37  ;;  %v1832_v37 = vld [vmem:[%s2373_s1 + $0x60] ss:$12 sps:$4 sm:$0xff]  }
 0x5f5   :  { %516 = vadd.xlane.f32.xlu0 %v515_v29  ;;  %1711 = vmatpush3.bf16.msra.mxu1 %v1832_v37 }
 0x5f6   :  { %v518_v31 = vsel %vm22_vm0, %v512_v30, 0.0  ;;  %1712 = vmatprep.subr.bf16.mxu1 %v1942_v17 }
 0x5f7   :  { %519 = vadd.xlane.f32.xlu1 %v518_v31 }
 0x5f9   :  { %1713 = vmatpush3.bf16.msra.mxu1 %v1833_v48 }
 0x682   :  { %v517_v32 = vpop.xlane.xlu0 %516 }
 0x683   :  { %v521_v33 = vmul.f32 0.03125, %v517_v32 }
 0x684   :  { %v520_v34 = vpop.xlane.xlu1 %519 }
 0x685   :  { %v523_v35 = vsub.f32 %v511_v28, %v521_v33  ;;  %v522_v38 = vmul.f32 0.03125, %v520_v34 }
 0x687   :  { %v524_v39 = vsub.f32 %v512_v30, %v522_v38  ;;  %v525_v42 = vmul.f32 %v523_v35, %v523_v35 }
 0x689   :  { %v527_v46 = vsel %vm22_vm0, %v525_v42, 0.0  ;;  %v526_v47 = vmul.f32 %v524_v39, %v524_v39 }
 0x68a   :  { %528 = vadd.xlane.f32.xlu0 %v527_v46 }
 0x68b   :  { %v530_v36 = vsel %vm22_vm0, %v526_v47, 0.0 }
 0x68c   :  { %531 = vadd.xlane.f32.xlu1 %v530_v36 }
 0x717   :  { %v529_v49 = vpop.xlane.xlu0 %528 }
 0x718   :  { %v533_v50 = vmul.f32 0.03125, %v529_v49 }
 0x719   :  { %v532_v51 = vpop.xlane.xlu1 %531 }
 0x71a   :  { %v535_v52 = vadd.f32 1e-12, %v533_v50  ;;  %v534_v53 = vmul.f32 0.03125, %v532_v51 }
 0x71c   :  { %1878 = vrsqrt.f32 %v535_v52  ;;  %v536_v54 = vadd.f32 1e-12, %v534_v53 }
 0x71e   :  { %1880 = vrsqrt.f32 %v536_v54 }
 0x726   :  { %v1879_v55 = vpop.eup %1878 }
 0x727   :  { %v539_v57 = vmul.f32 %v1879_v55, %v523_v35 }
 0x728   :  { %v1881_v58 = vpop.eup %1880 }
 0x729   :  { %v541_v59 = vmul.f32 %v539_v57, %v513_v56  ;;  %v540_v60 = vmul.f32 %v1881_v58, %v524_v39  ;;  %v634_v39 = vld [vmem:[%s2374_s2 + $0x7] ss:$0 sm:$0xff] }
 0x72b   :  { %v542_v63 = vmul.f32 %v540_v60, %v513_v56  ;;  %v543_v0 = vadd.f32 %v541_v59, %v514_v61 }
 0x72d   :  { %v544_v1 = vadd.f32 %v542_v63, %v514_v61 }
 0x72f   :  { %v545_v3 = vpack.c.bf16 %v544_v1, %v543_v0 }
 0x731   :  { %1715 = vmatmul.mubr.msk.bf16.vlgmr.msra.gmra.mrb[12].mxu1 %vm22_vm0, %v545_v3  ;;  %v1841_v3 = vld [vmem:[%s2373_s1 + $0x108] ss:$12 sps:$4 sm:$0xff]  }
 0x732   :  { %832 = vmatprep.mubr.bf16.mxu1 %v1943_v21  ;;  %v1837_v21 = vld [vmem:[%s2373_s1 + $0xd8] ss:$12 sps:$4 sm:$0xff]  }
 0x733   :  { %1725 = vmatpush3.bf16.msra.mxu0 %v1837_v21 }
 0x734   :  { %1738 = vmatprep.subr.bf16.mxu0 %v1942_v17 }
 0x804   :  { %v600_v9 = vpop.f32.mrb[12].mxu1 }
 0x805   :  { %v601_v10 = vadd.f32 %v600_v9, %v550_v8  ;;  %v1716_v12 = vpop.f32.mrb[13].mxu1 }
 0x806   :  { %v603_v13 = vpop.f32.mrb[14].mxu1 }
 0x807   :  { %v609_v2 = vmul.f32 0.044715, %v601_v10  ;;  %v604_v15 = vadd.f32 %v603_v13, %v550_v8  ;;  %v1717_v16 = vpop.f32.mrb[15].mxu1  ;;  %v607_v31 = vmul.f32 0.5, %v601_v10  ;;  %v706_v13 = vld [vmem:[%s2374_s2 + $0x18] ss:$0 sm:$0xff] }
 0x809   :  { %v611_v18 = vmul.f32 %v609_v2, %v601_v10  ;;  %v610_v19 = vmul.f32 0.044715, %v604_v15  ;;  %v608_v32 = vmul.f32 0.5, %v604_v15 }
 0x80b   :  { %v613_v20 = vmul.f32 %v611_v18, %v601_v10  ;;  %v612_v22 = vmul.f32 %v610_v19, %v604_v15  ;;  %v707_v19 = vld [vmem:[%s2374_s2 + $0x19] ss:$0 sm:$0xff] }
 0x80d   :  { %v615_v23 = vadd.f32 %v613_v20, %v601_v10  ;;  %v614_v24 = vmul.f32 %v612_v22, %v604_v15 }
 0x80f   :  { %v617_v25 = vmul.f32 0.7978846, %v615_v23  ;;  %v616_v26 = vadd.f32 %v614_v24, %v604_v15  ;;  %v1844_v24 = vld [vmem:[%s2373_s1 + $0xf8] ss:$12 sps:$4 sm:$0xff]  }
 0x811   :  { %1882 = vtanh.f32 %v617_v25  ;;  %v618_v27 = vmul.f32 0.7978846, %v616_v26  ;;  %v1845_v26 = vld [vmem:[%s2373_s1 + $0x110] ss:$12 sps:$4 sm:$0xff]  }
 0x813   :  { %1884 = vtanh.f32 %v618_v27  ;;  %v1584_v27 = vld [vmem:[%s2374_s2 + $0x1a] ss:$8 sm:$0x7] }
 0x81b   :  { %v1883_v28 = vpop.eup %1882 }
 0x81c   :  { %v621_v29 = vadd.f32 1.0, %v1883_v28  ;;  %v753_v28 = vrot.slane %v1584_v27, %v76_v41 }
 0x81d   :  { %v1885_v30 = vpop.eup %1884 }
 0x81e   :  { %v622_v33 = vadd.f32 1.0, %v1885_v30  ;;  %v623_v34 = vmul.f32 %v621_v29, %v607_v31  ;;  %v757_v30 = vrot.slane %v1584_v27, %v80_v44 }
 0x820   :  { %v624_v35 = vmul.f32 %v622_v33, %v608_v32 }
 0x822   :  { %v625_v38 = vpack.c.bf16 %v624_v35, %v623_v34 }
 0x824   :  { %1727 = vmatmul.mubr.msk.bf16.vlgmr.msra.gmra.mrb[12].mxu0 %vm659_vm9, %v625_v38 }
 0x825   :  { %1740 = vmatprep.mubr.msk.bf16.mxu0 %vm1944_vm1, %v1942_v17 }
 0x8f7   :  { %v697_v42 = vpop.f32.mrb[12].mxu0 }
 0x8f8   :  { %v698_v46 = vadd.f32 %v697_v42, %v634_v39  ;;  %v1728_v47 = vpop.f32.mrb[13].mxu0 }
 0x8f9   :  { %v700_v36 = vpop.f32.mrb[14].mxu0 }
 0x8fa   :  { %v701_v37 = vadd.f32 %v700_v36, %v634_v39  ;;  %v1729_v48 = vpop.f32.mrb[15].mxu0  ;;  %v704_v49 = vadd.f32 %v698_v46, %v543_v0  ;;  %v1840_v0 = vld [vmem:[%s2373_s1 + $0xf4] ss:$12 sps:$4 sm:$0xff]   ;;  %v761_v36 = vrot.slane %v1584_v27, %v84_v43 }
 0x8fb   :  { %800 = vmatprep.subr.bf16.mxu1 %v1840_v0 }
 0x8fc   :  { %v708_v50 = vsel %vm22_vm0, %v704_v49, 0.0  ;;  %v705_v51 = vadd.f32 %v701_v37, %v544_v1  ;;  %v1838_v1 = vld [vmem:[%s2373_s1 + $0xf0] ss:$12 sps:$4 sm:$0xff]  }
 0x8fd   :  { %709 = vadd.xlane.f32.xlu0 %v708_v50  ;;  %801 = vmatpush1.bf16.msra.mxu1 %v1838_v1 }
 0x8fe   :  { %v711_v52 = vsel %vm22_vm0, %v705_v51, 0.0  ;;  %802 = vmatprep.subr.bf16.mxu1 %v1843_v4 }
 0x8ff   :  { %712 = vadd.xlane.f32.xlu1 %v711_v52 }
 0x901   :  { %803 = vmatpush1.bf16.msra.mxu1 %v1841_v3 }
 0x902   :  { %1730 = vmatprep.subr.bf16.mxu1 %v1942_v17 }
 0x98a   :  { %v710_v53 = vpop.xlane.xlu0 %709 }
 0x98b   :  { %v714_v54 = vmul.f32 0.03125, %v710_v53 }
 0x98c   :  { %v713_v55 = vpop.xlane.xlu1 %712 }
 0x98d   :  { %v716_v56 = vsub.f32 %v704_v49, %v714_v54  ;;  %v715_v57 = vmul.f32 0.03125, %v713_v55 }
 0x98f   :  { %v717_v58 = vsub.f32 %v705_v51, %v715_v57  ;;  %v718_v59 = vmul.f32 %v716_v56, %v716_v56 }
 0x991   :  { %v720_v60 = vsel %vm22_vm0, %v718_v59, 0.0  ;;  %v719_v61 = vmul.f32 %v717_v58, %v717_v58 }
 0x992   :  { %721 = vadd.xlane.f32.xlu0 %v720_v60 }
 0x993   :  { %v723_v63 = vsel %vm22_vm0, %v719_v61, 0.0 }
 0x994   :  { %724 = vadd.xlane.f32.xlu1 %v723_v63 }
 0xa1f   :  { %v722_v5 = vpop.xlane.xlu0 %721 }
 0xa20   :  { %v726_v7 = vmul.f32 0.03125, %v722_v5 }
 0xa21   :  { %v725_v21 = vpop.xlane.xlu1 %724 }
 0xa22   :  { %v728_v8 = vadd.f32 1e-12, %v726_v7  ;;  %v727_v9 = vmul.f32 0.03125, %v725_v21 }
 0xa24   :  { %1886 = vrsqrt.f32 %v728_v8  ;;  %v729_v10 = vadd.f32 1e-12, %v727_v9 }
 0xa26   :  { %1888 = vrsqrt.f32 %v729_v10 }
 0xa2e   :  { %v1887_v12 = vpop.eup %1886 }
 0xa2f   :  { %v732_v2 = vmul.f32 %v1887_v12, %v716_v56 }
 0xa30   :  { %v1889_v15 = vpop.eup %1888 }
 0xa31   :  { %v734_v16 = vmul.f32 %v732_v2, %v706_v13  ;;  %v733_v18 = vmul.f32 %v1889_v15, %v717_v58 }
 0xa33   :  { %v735_v20 = vmul.f32 %v733_v18, %v706_v13  ;;  %v2193_v22 = vadd.f32 %v734_v16, %v707_v19 }
 0xa35   :  { %v2195_v23 = vadd.f32 %v735_v20, %v707_v19 }
 0xa37   :  { %v738_v25 = vpack.c.bf16 %v2195_v23, %v2193_v22 }
 0xa39   :  { %1591 = vmatmul.mubr.msk.bf16.vlgmr.msra.gmra.mrb[16].mxu1 %vm22_vm0, %v738_v25 }
 0xa3a   :  { %1731 = vmatpush3.bf16.msra.mxu1 %v1844_v24  ;;  %1734 = vmatprep.mubr.msk.bf16.mxu1 %vm1944_vm1, %v1942_v17 }
 0xa3b   :  { %1732 = vmatprep.subr.bf16.mxu1 %v1942_v17 }
 0xa3e   :  { %1733 = vmatpush3.bf16.msra.mxu1 %v1845_v26 }
 0xa3f   :  { %1744 = vmatprep.subr.bf16.mxu1 %v1942_v17 }
 0xa41   :  { %1735 = vmatmul.mubr.msk.bf16.vlgmr.msra.gmra.mrb[20].mxu1 %vm22_vm0, %v738_v25 }
 0xa42   :  { %1746 = vmatprep.mubr.msk.bf16.mxu1 %vm1944_vm1, %v1942_v17 }
 0xb0c   :  { %v834_v29 = vpop.f32.mrb[16].mxu1 }
 0xb0d   :  { %v835_v31 = vadd.f32 %v834_v29, %v753_v28  ;;  %v836_v32 = vpop.f32.mrb[17].mxu1 }
 0xb0e   :  { %v838_v33 = vpop.f32.mrb[18].mxu1  ;;  %v837_v39 = vadd.f32 %v836_v32, %v757_v30  ;;  %v1846_v32 = vld [vmem:[%s2373_s1 + $0x120] ss:$12 sps:$4 sm:$0xff]  }
 0xb0f   :  { %v884_v34 = vmul.f32 0.25, %v835_v31  ;;  %v839_v35 = vadd.f32 %v838_v33, %v753_v28  ;;  %v840_v38 = vpop.f32.mrb[19].mxu1 }
 0xb10   :  { %v841_v42 = vadd.f32 %v840_v38, %v757_v30 }
 0xb11   :  { %v885_v46 = vmul.f32 0.25, %v839_v35  ;;  %v887_v41 = vsel %vm57_vm4, %v884_v34, 0.0  ;;  %v963_v37 = vsel %vm2038_vm5, %v884_v34, 0.0 }
 0xb12   :  { %v886_v47 = vpack.c.bf16 %v841_v42, %v837_v39 }
 0xb13   :  { %v888_v44 = vsel %vm57_vm4, %v885_v46, 0.0  ;;  %v964_v48 = vsel %vm2038_vm5, %v885_v46, 0.0 }
 0xb14   :  { %v889_v49 = vpack.c.bf16 %v888_v44, %v887_v41  ;;  %v965_v50 = vpack.c.bf16 %v964_v48, %v963_v37  ;;  %v877_v51 = vpop.f32.mrb[20].mxu1  ;;  %v894_v52 = vsel %vm22_vm0, %v886_v47, 0 }
 0xb15   :  { %v1736_v53 = vpop.f32.mrb[21].mxu1  ;;  %1739 = vmatpush3.bf16.xpose.msra.mxu0 %v894_v52  ;;  %1745 = vmatpush3.bf16.xpose.msra.mxu1 %v894_v52  ;;  %v878_v43 = vadd.f32 %v877_v51, %v761_v36 }
 0xb16   :  { %v880_v40 = vpop.f32.mrb[22].mxu1  ;;  %1750 = vmatprep.subr.bf16.mxu0 %v1942_v17  ;;  %1762 = vmatprep.subr.bf16.mxu1 %v1942_v17 }
 0xb17   :  { %v881_v54 = vadd.f32 %v880_v40, %v761_v36  ;;  %v1737_v45 = vpop.f32.mrb[23].mxu1 }
 0xb19   :  { %v2233_v55 = vpack.c.bf16 %v881_v54, %v878_v43  ;;  %v1129_v43 = vld [vmem:[%s2374_s2 + $0x1b] ss:$0 sm:$0xff] }
 0xb1c   :  { %1741 = vmatmul.mubr.msk.bf16.vlgmr.msra.gmra.mrb[16].mxu0 %vm22_vm0, %v889_v49  ;;  %1747 = vmatmul.mubr.msk.bf16.vlgmr.msra.gmra.mrb[24].mxu1 %vm22_vm0, %v965_v50 }
 0xb1d   :  { %1751 = vmatpush3.bf16.msk.msra.mxu0 %vm1565_vm6, %v2233_v55  ;;  %1752 = vmatprep.mubr.msk.bf16.mxu0 %vm1944_vm1, %v1942_v17 }
 0xb1e   :  { %1756 = vmatprep.subr.bf16.mxu0 %v1942_v17  ;;  %1766 = vmatprep.mubr.msk.bf16.mxu1 %vm1944_vm1, %v1942_v17 }
 0xb1f   :  { %1763 = vmatpush3.bf16.msra.mxu1 %v1846_v32  ;;  %v1852_v32 = vld [vmem:[%s2373_s1 + $0x1b0] ss:$12 sps:$4 sm:$0xff]  }
 0xb20   :  { %1764 = vmatprep.subr.bf16.mxu1 %v1942_v17 }
 0xb23   :  { %1765 = vmatpush3.bf16.msra.mxu1 %v1847_v6 }
 0xb24   :  { %1770 = vmatprep.subr.bf16.mxu1 %v1942_v17 }
 0xbef   :  { %v930_v56 = vpop.f32.mrb[16].mxu0  ;;  %v1003_v57 = vpop.f32.mrb[24].mxu1 }
 0xbf0   :  { %v1004_v58 = vadd.f32 %v1003_v57, %v2074_v11  ;;  %v1742_v59 = vpop.f32.mrb[17].mxu0  ;;  %v1748_v60 = vpop.f32.mrb[25].mxu1  ;;  %v931_v62 = vadd.f32 %v930_v56, %v2074_v11 }
 0xbf1   :  { %v933_v61 = vpop.f32.mrb[18].mxu0  ;;  %v1006_v63 = vpop.f32.mrb[26].mxu1 }
 0xbf2   :  { %v1007_v0 = vadd.f32 %v1006_v63, %v2079_v14  ;;  %v1743_v1 = vpop.f32.mrb[19].mxu0  ;;  %v1749_v3 = vpop.f32.mrb[27].mxu1  ;;  %v1010_v4 = vsel %vm261_vm7, %v1004_v58, -inf  ;;  %v934_v5 = vadd.f32 %v933_v61, %v2079_v14  ;;  %v937_v21 = vsel %vm261_vm7, %v931_v62, -inf }
 0xbf3   :  { %1011 = vmax.xlane.f32.xlu0 %v1010_v4 }
 0xbf4   :  { %v1013_v7 = vsel %vm261_vm7, %v1007_v0, -inf  ;;  %v940_v8 = vsel %vm261_vm7, %v934_v5, -inf }
 0xbf5   :  { %1014 = vmax.xlane.f32.xlu1 %v1013_v7 }
 0xbf7   :  { %938 = vmax.xlane.f32.xlu0 %v937_v21 }
 0xbf9   :  { %941 = vmax.xlane.f32.xlu1 %v940_v8 }
 0xc80   :  { %v1012_v9 = vpop.xlane.xlu0 %1011 }
 0xc81   :  { %v1016_v11 = vsub.f32 %v1004_v58, %v1012_v9  ;;  %v1849_v9 = vld [vmem:[%s2373_s1 + $0x168] ss:$12 sps:$4 sm:$0xff]  }
 0xc82   :  { %v1015_v10 = vpop.xlane.xlu1 %1014 }
 0xc83   :  { %v1018_v12 = vmul.f32 1.442695, %v1016_v11  ;;  %v1017_v13 = vsub.f32 %v1007_v0, %v1015_v10 }
 0xc84   :  { %v939_v2 = vpop.xlane.xlu0 %938 }
 0xc85   :  { %1890 = vpow2.f32 %v1018_v12  ;;  %v1020_v15 = vmul.f32 1.442695, %v1017_v13  ;;  %v943_v16 = vsub.f32 %v931_v62, %v939_v2 }
 0xc86   :  { %v942_v18 = vpop.xlane.xlu1 %941 }
 0xc87   :  { %1892 = vpow2.f32 %v1020_v15  ;;  %v945_v14 = vmul.f32 1.442695, %v943_v16  ;;  %v944_v19 = vsub.f32 %v934_v5, %v942_v18  ;;  %v1188_v18 = vld [vmem:[%s2374_s2 + $0x1c] ss:$0 sm:$0xff] }
 0xc89   :  { %1894 = vpow2.f32 %v945_v14  ;;  %v947_v20 = vmul.f32 1.442695, %v944_v19 }
 0xc8b   :  { %1896 = vpow2.f32 %v947_v20 }
 0xc8f   :  { %v1891_v24 = vpop.eup %1890 }
 0xc90   :  { %v1022_v25 = vsel %vm261_vm7, %v1891_v24, 0.0 }
 0xc91   :  { %v1893_v26 = vpop.eup %1892  ;;  %1023 = vadd.xlane.f32.xlu0 %v1022_v25  ;;  %v1189_v25 = vld [vmem:[%s2374_s2 + $0x1d] ss:$0 sm:$0xff] }
 0xc92   :  { %v1025_v27 = vsel %vm261_vm7, %v1893_v26, 0.0 }
 0xc93   :  { %v1895_v28 = vpop.eup %1894  ;;  %1026 = vadd.xlane.f32.xlu1 %v1025_v27 }
 0xc94   :  { %v949_v29 = vsel %vm261_vm7, %v1895_v28, 0.0 }
 0xc95   :  { %v1897_v30 = vpop.eup %1896  ;;  %950 = vadd.xlane.f32.xlu0 %v949_v29 }
 0xc96   :  { %v952_v31 = vsel %vm261_vm7, %v1897_v30, 0.0 }
 0xc97   :  { %953 = vadd.xlane.f32.xlu1 %v952_v31  ;;  %v1851_v31 = vld [vmem:[%s2373_s1 + $0x198] ss:$12 sps:$4 sm:$0xff]  }
 0xd1e   :  { %v1024_v33 = vpop.xlane.xlu0 %1023 }
 0xd1f   :  { %1898 = vrcp.f32 %v1024_v33  ;;  %v1853_v33 = vld [vmem:[%s2373_s1 + $0x1c8] ss:$12 sps:$4 sm:$0xff]  }
 0xd20   :  { %v1027_v34 = vpop.xlane.xlu1 %1026 }
 0xd21   :  { %1900 = vrcp.f32 %v1027_v34  ;;  %v1225_v34 = vld [vmem:[%s2374_s2 + $0x1e] ss:$0 sm:$0xff] }
 0xd22   :  { %v951_v38 = vpop.xlane.xlu0 %950 }
 0xd24   :  { %v954_v35 = vpop.xlane.xlu1 %953 }
 0xd25   :  { %1902 = vrcp.f32 %v954_v35 }
 0xd26   :  { %1904 = vrcp.f32 %v951_v38 }
 0xd29   :  { %v1899_v39 = vpop.eup %1898 }
 0xd2a   :  { %v1030_v46 = vmul.f32 %v1899_v39, %v1891_v24 }
 0xd2b   :  { %v1901_v42 = vpop.eup %1900 }
 0xd2c   :  { %v1031_v47 = vmul.f32 %v1901_v42, %v1893_v26 }
 0xd2e   :  { %v1035_v36 = vpack.c.bf16 %v1031_v47, %v1030_v46 }
 0xd2f   :  { %v1903_v41 = vpop.eup %1902 }
 0xd30   :  { %1753 = vmatmul.mubr.msk.bf16.vlgmr.msra.gmra.mrb[20].mxu0 %vm261_vm7, %v1035_v36  ;;  %v1905_v37 = vpop.eup %1904  ;;  %v958_v44 = vmul.f32 %v1903_v41, %v1897_v30  ;;  %v1850_v30 = vld [vmem:[%s2373_s1 + $0x180] ss:$12 sps:$4 sm:$0xff]  }
 0xd31   :  { %1757 = vmatpush3.bf16.msk.msra.mxu0 %vm2100_vm8, %v2233_v55  ;;  %1758 = vmatprep.mubr.msk.bf16.mxu0 %vm1944_vm1, %v1942_v17  ;;  %v957_v48 = vmul.f32 %v1905_v37, %v1895_v28 }
 0xd32   :  { %1778 = vmatprep.subr.bf16.mxu0 %v1942_v17 }
 0xd33   :  { %v962_v49 = vpack.c.bf16 %v958_v44, %v957_v48 }
 0xd3c   :  { %1759 = vmatmul.mubr.msk.bf16.vlgmr.msra.gmra.mrb[20].mxu0 %vm261_vm7, %v962_v49 }
 0xd3d   :  { %1786 = vmatprep.mubr.msk.bf16.mxu0 %vm1944_vm1, %v1942_v17  ;;  %1779 = vmatpush3.bf16.msra.mxu0 %v1850_v30  ;;  %v1381_v30 = vld [vmem:[%s2374_s2 + $0x31] ss:$0 sm:$0xff] }
 0xd3e   :  { %1780 = vmatprep.subr.bf16.mxu0 %v1942_v17 }
 0xd41   :  { %1781 = vmatpush3.bf16.msra.mxu0 %v1851_v31 }
 0xd42   :  { %1782 = vmatprep.subr.bf16.mxu0 %v1942_v17 }
 0xd45   :  { %1783 = vmatpush3.bf16.msra.mxu0 %v1852_v32 }
 0xd46   :  { %1784 = vmatprep.subr.bf16.mxu0 %v1942_v17 }
 0xd49   :  { %1785 = vmatpush3.bf16.msra.mxu0 %v1853_v33 }
 0xe0f   :  { %v1117_v50 = vpop.f32.mrb[20].mxu0 }
 0xe10   :  { %v1760_v51 = vpop.f32.mrb[21].mxu0 }
 0xe11   :  { %v1120_v52 = vpop.f32.mrb[22].mxu0 }
 0xe12   :  { %v1124_v53 = vpack.c.bf16 %v1120_v52, %v1117_v50  ;;  %v1761_v40 = vpop.f32.mrb[23].mxu0 }
 0xe14   :  { %1767 = vmatmul.mubr.msk.bf16.vlgmr.msra.gmra.mrb[28].mxu1 %vm22_vm0, %v1124_v53 }
 0xe15   :  { %1774 = vmatprep.mubr.msk.bf16.mxu1 %vm1944_vm1, %v1942_v17 }
 0xee7   :  { %v1179_v54 = vpop.f32.mrb[28].mxu1 }
 0xee8   :  { %v1180_v45 = vadd.f32 %v1179_v54, %v1129_v43  ;;  %v1768_v55 = vpop.f32.mrb[29].mxu1 }
 0xee9   :  { %v1182_v56 = vpop.f32.mrb[30].mxu1 }
 0xeea   :  { %v1183_v57 = vadd.f32 %v1182_v56, %v1129_v43  ;;  %v1769_v58 = vpop.f32.mrb[31].mxu1  ;;  %v1186_v59 = vadd.f32 %v1180_v45, %v2193_v22 }
 0xeec   :  { %v1190_v60 = vsel %vm22_vm0, %v1186_v59, 0.0  ;;  %v1187_v61 = vadd.f32 %v1183_v57, %v2195_v23  ;;  %v1848_v23 = vld [vmem:[%s2373_s1 + $0x150] ss:$12 sps:$4 sm:$0xff]  }
 0xeed   :  { %1191 = vadd.xlane.f32.xlu0 %v1190_v60  ;;  %1771 = vmatpush3.bf16.msra.mxu1 %v1848_v23 }
 0xeee   :  { %v1193_v63 = vsel %vm22_vm0, %v1187_v61, 0.0  ;;  %1772 = vmatprep.subr.bf16.mxu1 %v1942_v17 }
 0xeef   :  { %1194 = vadd.xlane.f32.xlu1 %v1193_v63 }
 0xef1   :  { %1773 = vmatpush3.bf16.msra.mxu1 %v1849_v9 }
 0xef2   :  { %1790 = vmatprep.subr.bf16.mxu1 %v1942_v17 }
 0xf7a   :  { %v1192_v62 = vpop.xlane.xlu0 %1191 }
 0xf7b   :  { %v1196_v0 = vmul.f32 0.03125, %v1192_v62 }
 0xf7c   :  { %v1195_v1 = vpop.xlane.xlu1 %1194 }
 0xf7d   :  { %v1198_v3 = vsub.f32 %v1186_v59, %v1196_v0  ;;  %v1197_v4 = vmul.f32 0.03125, %v1195_v1  ;;  %v1309_v59 = vld [vmem:[%s2374_s2 + $0x1f] ss:$0 sm:$0xff] }
 0xf7f   :  { %v1199_v5 = vsub.f32 %v1187_v61, %v1197_v4  ;;  %v1200_v7 = vmul.f32 %v1198_v3, %v1198_v3 }
 0xf81   :  { %v1202_v21 = vsel %vm22_vm0, %v1200_v7, 0.0  ;;  %v1201_v8 = vmul.f32 %v1199_v5, %v1199_v5 }
 0xf82   :  { %1203 = vadd.xlane.f32.xlu0 %v1202_v21 }
 0xf83   :  { %v1205_v22 = vsel %vm22_vm0, %v1201_v8, 0.0 }
 0xf84   :  { %1206 = vadd.xlane.f32.xlu1 %v1205_v22 }
0x100f   :  { %v1204_v11 = vpop.xlane.xlu0 %1203 }
0x1010   :  { %v1208_v10 = vmul.f32 0.03125, %v1204_v11 }
0x1011   :  { %v1207_v12 = vpop.xlane.xlu1 %1206 }
0x1012   :  { %v1210_v13 = vadd.f32 1e-12, %v1208_v10  ;;  %v1209_v2 = vmul.f32 0.03125, %v1207_v12 }
0x1014   :  { %1906 = vrsqrt.f32 %v1210_v13  ;;  %v1211_v15 = vadd.f32 1e-12, %v1209_v2 }
0x1016   :  { %1908 = vrsqrt.f32 %v1211_v15  ;;  %v1854_v15 = vld [vmem:[%s2373_s1 + $0x210] ss:$12 sps:$4 sm:$0xff]  }
0x101e   :  { %v1907_v16 = vpop.eup %1906 }
0x101f   :  { %v1214_v14 = vmul.f32 %v1907_v16, %v1198_v3  ;;  %v1855_v16 = vld [vmem:[%s2373_s1 + $0x228] ss:$12 sps:$4 sm:$0xff]  }
0x1020   :  { %v1909_v19 = vpop.eup %1908 }
0x1021   :  { %v1216_v20 = vmul.f32 %v1214_v14, %v1188_v18  ;;  %v1215_v24 = vmul.f32 %v1909_v19, %v1199_v5 }
0x1023   :  { %v1217_v26 = vmul.f32 %v1215_v24, %v1188_v18  ;;  %v1218_v27 = vadd.f32 %v1216_v20, %v1189_v25 }
0x1025   :  { %v1219_v28 = vadd.f32 %v1217_v26, %v1189_v25 }
0x1027   :  { %v1220_v29 = vpack.c.bf16 %v1219_v28, %v1218_v27 }
0x1029   :  { %1775 = vmatmul.mubr.msk.bf16.vlgmr.msra.gmra.mrb[32].mxu1 %vm22_vm0, %v1220_v29 }
0x102a   :  { %1794 = vmatprep.mubr.msk.bf16.mxu1 %vm1944_vm1, %v1942_v17  ;;  %1791 = vmatpush3.bf16.msra.mxu1 %v1854_v15 }
0x102b   :  { %1792 = vmatprep.subr.bf16.mxu1 %v1942_v17 }
0x102e   :  { %1793 = vmatpush3.bf16.msra.mxu1 %v1855_v16 }
0x102f   :  { %1798 = vmatprep.subr.bf16.mxu1 %v1942_v17 }
0x10fc   :  { %v1275_v35 = vpop.f32.mrb[32].mxu1 }
0x10fd   :  { %v1276_v38 = vadd.f32 %v1275_v35, %v1225_v34  ;;  %v1776_v39 = vpop.f32.mrb[33].mxu1 }
0x10fe   :  { %v1278_v42 = vpop.f32.mrb[34].mxu1  ;;  %v1856_v39 = vld [vmem:[%s2373_s1 + $0x1e0] ss:$12 sps:$4 sm:$0xff]  }
0x10ff   :  { %v1284_v46 = vmul.f32 0.044715, %v1276_v38  ;;  %v1279_v47 = vadd.f32 %v1278_v42, %v1225_v34  ;;  %v1777_v36 = vpop.f32.mrb[35].mxu1  ;;  %v1282_v54 = vmul.f32 0.5, %v1276_v38 }
0x1101   :  { %v1286_v41 = vmul.f32 %v1284_v46, %v1276_v38  ;;  %v1285_v37 = vmul.f32 0.044715, %v1279_v47  ;;  %v1283_v45 = vmul.f32 0.5, %v1279_v47  ;;  %v1857_v46 = vld [vmem:[%s2373_s1 + $0x1f8] ss:$12 sps:$4 sm:$0xff]  }
0x1103   :  { %v1288_v44 = vmul.f32 %v1286_v41, %v1276_v38  ;;  %v1287_v48 = vmul.f32 %v1285_v37, %v1279_v47 }
0x1105   :  { %v1290_v49 = vadd.f32 %v1288_v44, %v1276_v38  ;;  %v1289_v6 = vmul.f32 %v1287_v48, %v1279_v47 }
0x1107   :  { %v1292_v50 = vmul.f32 0.7978846, %v1290_v49  ;;  %v1291_v51 = vadd.f32 %v1289_v6, %v1279_v47 }
0x1109   :  { %1910 = vtanh.f32 %v1292_v50  ;;  %v1293_v52 = vmul.f32 0.7978846, %v1291_v51 }
0x110b   :  { %1912 = vtanh.f32 %v1293_v52 }
0x1113   :  { %v1911_v53 = vpop.eup %1910 }
0x1114   :  { %v1296_v40 = vadd.f32 1.0, %v1911_v53 }
0x1115   :  { %v1913_v43 = vpop.eup %1912 }
0x1116   :  { %v1297_v55 = vadd.f32 1.0, %v1913_v43  ;;  %v1298_v56 = vmul.f32 %v1296_v40, %v1282_v54 }
0x1118   :  { %v1299_v57 = vmul.f32 %v1297_v55, %v1283_v45 }
0x111a   :  { %v1300_v58 = vpack.c.bf16 %v1299_v57, %v1298_v56 }
0x111c   :  { %1787 = vmatmul.mubr.msk.bf16.vlgmr.msra.gmra.mrb[24].mxu0 %vm659_vm9, %v1300_v58 }
0x11ef   :  { %v1371_v60 = vpop.f32.mrb[24].mxu0 }
0x11f0   :  { %v1372_v61 = vadd.f32 %v1371_v60, %v1309_v59  ;;  %v1788_v63 = vpop.f32.mrb[25].mxu0 }
0x11f1   :  { %v1374_v62 = vpop.f32.mrb[26].mxu0 }
0x11f2   :  { %v1375_v0 = vadd.f32 %v1374_v62, %v1309_v59  ;;  %v1789_v1 = vpop.f32.mrb[27].mxu0  ;;  %v1378_v3 = vadd.f32 %v1372_v61, %v1218_v27  ;;  %v1380_v27 = vld [vmem:[%s2374_s2 + $0x30] ss:$0 sm:$0xff] }
0x11f4   :  { %v1382_v4 = vsel %vm22_vm0, %v1378_v3, 0.0  ;;  %v1379_v5 = vadd.f32 %v1375_v0, %v1219_v28 }
0x11f5   :  { %1383 = vadd.xlane.f32.xlu0 %v1382_v4 }
0x11f6   :  { %v1385_v7 = vsel %vm22_vm0, %v1379_v5, 0.0 }
0x11f7   :  { %1386 = vadd.xlane.f32.xlu1 %v1385_v7 }
0x1282   :  { %v1384_v21 = vpop.xlane.xlu0 %1383 }
0x1283   :  { %v1388_v8 = vmul.f32 0.03125, %v1384_v21 }
0x1284   :  { %v1387_v22 = vpop.xlane.xlu1 %1386 }
0x1285   :  { %v1390_v23 = vsub.f32 %v1378_v3, %v1388_v8  ;;  %v1389_v9 = vmul.f32 0.03125, %v1387_v22 }
0x1287   :  { %v1391_v11 = vsub.f32 %v1379_v5, %v1389_v9  ;;  %v1392_v10 = vmul.f32 %v1390_v23, %v1390_v23 }
0x1289   :  { %v1394_v12 = vsel %vm22_vm0, %v1392_v10, 0.0  ;;  %v1393_v13 = vmul.f32 %v1391_v11, %v1391_v11 }
0x128a   :  { %1395 = vadd.xlane.f32.xlu0 %v1394_v12 }
0x128b   :  { %v1397_v2 = vsel %vm22_vm0, %v1393_v13, 0.0 }
0x128c   :  { %1398 = vadd.xlane.f32.xlu1 %v1397_v2 }
0x1317   :  { %v1396_v18 = vpop.xlane.xlu0 %1395 }
0x1318   :  { %v1400_v14 = vmul.f32 0.03125, %v1396_v18 }
0x1319   :  { %v1399_v19 = vpop.xlane.xlu1 %1398 }
0x131a   :  { %v1402_v20 = vadd.f32 1e-12, %v1400_v14  ;;  %v1401_v24 = vmul.f32 0.03125, %v1399_v19 }
0x131c   :  { %1914 = vrsqrt.f32 %v1402_v20  ;;  %v1403_v25 = vadd.f32 1e-12, %v1401_v24 }
0x131e   :  { %1916 = vrsqrt.f32 %v1403_v25 }
0x1326   :  { %v1915_v26 = vpop.eup %1914 }
0x1327   :  { %v1406_v28 = vmul.f32 %v1915_v26, %v1390_v23 }
0x1328   :  { %v1917_v29 = vpop.eup %1916 }
0x1329   :  { %v1408_v31 = vmul.f32 %v1406_v28, %v1380_v27  ;;  %v1407_v32 = vmul.f32 %v1917_v29, %v1391_v11 }
0x132b   :  { %v1410_v33 = vadd.f32 %v1408_v31, %v1381_v30  ;;  %v1409_v34 = vmul.f32 %v1407_v32, %v1380_v27 }
0x132d   :  { %1412 = vst.msk [vmem:[#allocation2] sm:$0xff] %vm22_vm0, %v1410_v33  ;;  %v1411_v35 = vadd.f32 %v1409_v34, %v1381_v30 }
0x132f   :  { %1413 = vst.msk [vmem:[#allocation2 + $0x8] sm:$0xff] %vm22_vm0, %v1411_v35 }
0x1336   :  { %v1417_v38 = vld [vmem:[#allocation2 + $0x7] ss:$8 sm:$0x3]  ;;  %v1415_v47 = vld [vmem:[#allocation2 + $0x6] ss:$8 sm:$0x3] }
0x1337   :  { %v1427_v42 = vpack.c.bf16 %v1417_v38, %v1417_v38  ;;  %v1426_v36 = vpack.c.bf16 %v1415_v47, %v1415_v47 }
0x1339   :  { %1795 = vmatmul.mubr.msk.bf16.vlgmr.msra.gmra.mrb[36].mxu1 %vm22_vm0, %v1427_v42 }
0x133a   :  { %1799 = vmatpush3.bf16.msra.mxu1 %v1856_v39  ;;  %1802 = vmatprep.mubr.msk.bf16.mxu1 %vm1944_vm1, %v1942_v17 }
0x133b   :  { %1800 = vmatprep.subr.bf16.mxu1 %v1942_v17 }
0x133e   :  { %1801 = vmatpush3.bf16.msra.mxu1 %v1857_v46 }
0x1345   :  { %1803 = vmatmul.mubr.msk.bf16.vlgmr.msra.gmra.mrb[36].mxu1 %vm22_vm0, %v1426_v36 }
0x1418   :  { %v1532_v41 = vpop.f32.mrb[36].mxu1 }
0x1419   :  { %1539 = vst.msk [vmem:[#allocation3] sm:$0x3] %vm1538_vm10, %v1532_v41  ;;  %v1804_v37 = vpop.f32.mrb[37].mxu1 }
0x141a   :  { %v1535_v44 = vpop.f32.mrb[38].mxu1 }
0x141b   :  { %1929 = shalt.err (!%p1926_p4)
}
0x141c   :  { %s1930_s11 = scalar_lea.hbm %s2375_s3, 32 }
0x141d   :  { %p1931_p5 = scmp.ne.s32.totalorder %s2375_s3, %s1930_s11  ;;  %p1934_p6 = scmp.lt.u32.totalorder %s1930_s11, %s2375_s3 }
0x141f   :  { %p1936_p7 = pnand %p1934_p6, %p1931_p5 }
0x1421   :  { %1939 = shalt.err (!%p1936_p7)
}
0x1422   :  { %1549 = dma.vmem_to_hbm [thread:$0]  %s1547_s9, 32, %s2375_s3, [#allocation4]   ;;  %v1805_v17 = vpop.f32.mrb[39].mxu1 }
0x1423   :  { %1940 = dma.done.wait [#allocation4], 32  }
0x1424   :  { %1941 = vsyncadd [#allocation4], 4294967264 }
0x1425   :  { %1553 = vsyncpa [#allocation4], 1 }

</bundles_post_ra>
